<compile_context>
chip_gen: v6e
topology: v6e:2x2x1
jax: 0.10.0
libtpu: 0.0.40
codegen_flags: <defaults>
</compile_context>

<pallas_src>
import jax
import jax.numpy as jnp
from jax.experimental import pallas as pl
from jax.experimental.pallas import tpu as pltpu

# ------------------------- configuration (small shapes) -------------------------
B = 8                      # batch (fills one f32 sublane group)
N_GENES = 128              # n_genes
N_LATENT = 32              # n_latent
N_PERT_LATENT = 16
N_CELL_TYPE_LATENT = 16
N_BATCH_LATENT = 8
N_HIDDEN = 64              # n_hidden_encoder == n_hidden_decoder
N_LAYERS = 3               # n_layers_encoder == n_layers_decoder
N_PERTS = 10
N_CELL_TYPES = 5
N_BATCHES = 3
N_DEC_IN = N_LATENT + N_CELL_TYPE_LATENT + N_BATCH_LATENT + N_PERT_LATENT  # 72

_BN_EPS = 1e-5
_VAR_EPS = 1e-4
_W_DTYPE = jnp.bfloat16    # weight storage / MXU input dtype (f32 accumulate)

# ---------------------------- packed-slab layouts ----------------------------
# bf16 weight slab: (128 rows, 768 cols); unused entries are zero.
W_COLS = 768
#   cols   0: 64  enc_w0      (rows 0:128)         genes -> hidden
#   cols  64:128  dec_w0      (rows 0:72 used)     z(padded to 128) -> hidden
#   cols 128:192  enc_w1      (rows 0:64)
#   cols 192:256  enc_w2      (rows 0:64)
#   cols 256:320  enc head    [w_mean | w_var]     hidden -> 2*latent
#   cols 320:384  dec_w1      (rows 0:64)
#   cols 384:448  dec_w2      (rows 0:64)
#   cols 448:704  dec head    [w_scale | w_dropout] hidden -> 2*genes

# f32 consts slab: (48 rows, 256 cols); unused entries are zero.
C_ROWS, C_COLS = 48, 256
#   rows  0:9   cols 0:64   encoder per-layer [bias, gamma, beta] x 3
#   rows  9:18  cols 0:64   decoder per-layer [bias, gamma, beta] x 3
#   row  18     cols 0:64   encoder head bias [b_mean | b_var]
#   row  19     cols 0:256  decoder head bias [b_scale | b_dropout]
#   rows 24:48  cols 0:96   block-diagonal embedding table:
#     rows 24:29 cols  0:16  cell_type_emb   (one-hot offset 0)
#     rows 29:32 cols 16:24  batch_emb       (one-hot offset 5)
#     rows 32:42 cols 24:40  pert_emb        (one-hot offset 8)
EMB_ROWS = 24              # one-hot width / embedding slice row count
EMB_COLS = 96              # 40 real cols + 56 zero cols = z lane-padding for free

# single lane-dense f32 output slab: (B, 640)
OUT_W = 640
_O_QM, _O_QS, _O_ZB, _O_LIB = 0, 32, 64, 96    # qz_mean | qz_std | z_basal | library
_O_Z = 128                                      # z padded 72 -> 128
_O_SCALE, _O_RATE, _O_DROP = 256, 384, 512      # px_scale | px_rate | px_dropout


# --------------------------------- kernel ----------------------------------
def _bn_relu(h, gamma, beta):
    """FCLayers block tail: BatchNorm1d (train-mode batch stats) + ReLU (f32)."""
    mean = jnp.mean(h, axis=0, keepdims=True)
    var = jnp.mean((h - mean) ** 2, axis=0, keepdims=True)
    h = (h - mean) * jax.lax.rsqrt(var + _BN_EPS) * gamma + beta
    return jnp.maximum(h, 0.0)


def _mlp(h, w_list, bn):
    """FCLayers stack: Linear -> (+bias) -> BN -> ReLU, one entry of w_list per layer.

    w_list: bf16 weight blocks (already sliced from the weight slab).
    bn:     (3*n_layers, H) f32 slab of [bias, gamma, beta] rows per layer.
    """
    for li, w in enumerate(w_list):
        h = jnp.dot(h.astype(_W_DTYPE), w, preferred_element_type=jnp.float32)
        h = h + bn[3 * li:3 * li + 1, :]
        h = _bn_relu(h, bn[3 * li + 1:3 * li + 2, :], bn[3 * li + 2:3 * li + 3, :])
    return h


def scvi_fused_kernel(xn_ref, idx_ref, w_ref, c_ref, out_ref):
    xn = xn_ref[...]                                 # (B, 160) = [x | noise]
    x = xn[:, :N_GENES]
    noise = xn[:, N_GENES:N_GENES + N_LATENT]
    bsz = x.shape[0]

    # library = log(x.sum(1)); keep the raw row sum for px_rate (no exp(log) trip).
    sum_x = jnp.sum(x, axis=1, keepdims=True)
    library = jnp.log(sum_x)

    # ------------------------------ encoder ------------------------------
    enc_bn = c_ref[0:9, 0:N_HIDDEN]
    enc_ws = [w_ref[:, 0:64],                        # (128, 64) genes -> hidden
              w_ref[0:N_HIDDEN, 128:192],
              w_ref[0:N_HIDDEN, 192:256]]
    h = _mlp(jnp.log1p(x), enc_ws, enc_bn)

    # Fused variational heads: one (H, 2*latent) matmul, then split.
    hq = jnp.dot(h.astype(_W_DTYPE), w_ref[0:N_HIDDEN, 256:320],
                 preferred_element_type=jnp.float32) + c_ref[18:19, 0:2 * N_LATENT]
    q_m = hq[:, :N_LATENT]
    q_v = jax.nn.softplus(hq[:, N_LATENT:]) + _VAR_EPS
    q_std = jnp.sqrt(q_v)
    # z_basal = qz.rsample()  (z_transformation = identity for Normal latent)
    # TODO(synk): eps could be drawn in-kernel (pltpu.prng_seed + stateful_normal)
    # to drop it from the input slab; kept as host input for parity with torch's
    # rsample noise stream.
    z_basal = q_m + q_std * noise

    # ------------- fused embedding gather: one multi-hot matmul -------------
    # one-hot lanes: [cell_type(0:5) | batch(5:8) | pert(8:18) | unused(18:24)]
    idx = idx_ref[...]                               # (B, 3) i32 = [pert, ct, batch]
    iota = jax.lax.broadcasted_iota(jnp.int32, (bsz, EMB_ROWS), 1)
    onehot = ((iota == idx[:, 1:2]) |
              (iota == idx[:, 2:3] + N_CELL_TYPES) |
              (iota == idx[:, 0:1] + N_CELL_TYPES + N_BATCHES)).astype(jnp.float32)
    emb = c_ref[24:48, 0:EMB_COLS]                   # block-diag table (24, 96)
    combined = jnp.dot(onehot, emb, preferred_element_type=jnp.float32)  # (B, 96)

    # z (torch order [z_basal, z_covs, z_batch, z_pert]) padded to 128 lanes:
    # combined already is [z_covs | z_batch | z_pert | zeros(56)].
    z_pad = jnp.concatenate([z_basal, combined], axis=-1)               # (B, 128)

    # ------------------------------ decoder ------------------------------
    dec_bn = c_ref[9:18, 0:N_HIDDEN]
    dec_ws = [w_ref[:, 64:128],                      # (128, 64); rows 72:128 are zero
              w_ref[0:N_HIDDEN, 320:384],
              w_ref[0:N_HIDDEN, 384:448]]
    hd = _mlp(z_pad, dec_ws, dec_bn)

    # Fused heads: [px_scale logits | px_dropout] = one (H, 2*genes) matmul.
    head = jnp.dot(hd.astype(_W_DTYPE), w_ref[0:N_HIDDEN, 448:704],
                   preferred_element_type=jnp.float32) + c_ref[19:20, 0:2 * N_GENES]
    logits = head[:, :N_GENES]
    px_dropout = head[:, N_GENES:]

    # px_scale = softmax(logits)  (exact divide so rows sum to 1, like torch)
    m = jnp.max(logits, axis=-1, keepdims=True)
    e = jnp.exp(logits - m)
    px_scale = e / jnp.sum(e, axis=-1, keepdims=True)

    # px_rate = exp(library) * px_scale == sum(x) * px_scale
    px_rate = sum_x * px_scale

    # --------------------- single lane-dense packed output ---------------------
    lib_b = jnp.broadcast_to(library, (bsz, N_LATENT))
    out_ref[...] = jnp.concatenate(
        [q_m, q_std, z_basal, lib_b, z_pad, px_scale, px_rate, px_dropout], axis=-1)


# ------------------------------- parameters --------------------------------
def _linear_init(key, fan_in, fan_out):
    k1, k2 = jax.random.split(key)
    bound = 1.0 / float(fan_in) ** 0.5
    w = jax.random.uniform(k1, (fan_in, fan_out), jnp.float32, -bound, bound)
    b = jax.random.uniform(k2, (fan_out,), jnp.float32, -bound, bound)
    return w, b


def init_params(seed=0):
    keys = jax.random.split(jax.random.PRNGKey(seed), 16)
    ki = iter(keys)

    # encoder FCLayers (3 layers) + variational heads
    enc_w0, enc_b0 = _linear_init(next(ki), N_GENES, N_HIDDEN)
    enc_w1, enc_b1 = _linear_init(next(ki), N_HIDDEN, N_HIDDEN)
    enc_w2, enc_b2 = _linear_init(next(ki), N_HIDDEN, N_HIDDEN)
    enc_wm, enc_bm = _linear_init(next(ki), N_HIDDEN, N_LATENT)
    enc_wv, enc_bv = _linear_init(next(ki), N_HIDDEN, N_LATENT)
    # decoder FCLayers (3 layers) + [scale | dropout] heads
    dec_w0, dec_b0 = _linear_init(next(ki), N_DEC_IN, N_HIDDEN)
    dec_w1, dec_b1 = _linear_init(next(ki), N_HIDDEN, N_HIDDEN)
    dec_w2, dec_b2 = _linear_init(next(ki), N_HIDDEN, N_HIDDEN)
    dec_ws, dec_bs = _linear_init(next(ki), N_HIDDEN, N_GENES)
    dec_wd, dec_bd = _linear_init(next(ki), N_HIDDEN, N_GENES)
    # embeddings (nn.Embedding default init ~ N(0, 1)) and px_r (~ randn)
    pert_emb = jax.random.normal(next(ki), (N_PERTS, N_PERT_LATENT), jnp.float32)
    ct_emb = jax.random.normal(next(ki), (N_CELL_TYPES, N_CELL_TYPE_LATENT), jnp.float32)
    batch_emb = jax.random.normal(next(ki), (N_BATCHES, N_BATCH_LATENT), jnp.float32)
    px_r = jax.random.normal(next(ki), (1, N_GENES), jnp.float32)

    # ---- bf16 weight slab ----
    w = jnp.zeros((N_GENES, W_COLS), jnp.float32)
    w = w.at[:, 0:64].set(enc_w0)
    w = w.at[0:N_DEC_IN, 64:128].set(dec_w0)               # rows 72:128 stay zero
    w = w.at[0:N_HIDDEN, 128:192].set(enc_w1)
    w = w.at[0:N_HIDDEN, 192:256].set(enc_w2)
    w = w.at[0:N_HIDDEN, 256:320].set(jnp.concatenate([enc_wm, enc_wv], axis=1))
    w = w.at[0:N_HIDDEN, 320:384].set(dec_w1)
    w = w.at[0:N_HIDDEN, 384:448].set(dec_w2)
    w = w.at[0:N_HIDDEN, 448:704].set(jnp.concatenate([dec_ws, dec_wd], axis=1))

    # ---- f32 consts slab (biases, BN affine, block-diag embeddings) ----
    ones = jnp.ones((N_HIDDEN,), jnp.float32)
    zeros = jnp.zeros((N_HIDDEN,), jnp.float32)
    enc_bn = jnp.stack([enc_b0, ones, zeros, enc_b1, ones, zeros, enc_b2, ones, zeros])
    dec_bn = jnp.stack([dec_b0, ones, zeros, dec_b1, ones, zeros, dec_b2, ones, zeros])

    c = jnp.zeros((C_ROWS, C_COLS), jnp.float32)
    c = c.at[0:9, 0:N_HIDDEN].set(enc_bn)
    c = c.at[9:18, 0:N_HIDDEN].set(dec_bn)
    c = c.at[18, 0:2 * N_LATENT].set(jnp.concatenate([enc_bm, enc_bv]))
    c = c.at[19, 0:2 * N_GENES].set(jnp.concatenate([dec_bs, dec_bd]))
    c = c.at[24:29, 0:16].set(ct_emb)
    c = c.at[29:32, 16:24].set(batch_emb)
    c = c.at[32:42, 24:40].set(pert_emb)

    return dict(wslab=w.astype(_W_DTYPE), consts=c, px_r=px_r)


# ------------------------------- forward pass -------------------------------
def scvi_forward(params, x_basal, perts, cell_types, batch_ids, noise):
    """Equivalent of scVIModule.forward(...) with recon_loss='nb', n_samples=1."""
    vmem = pl.BlockSpec(memory_space=pltpu.MemorySpace.VMEM)
    bsz = x_basal.shape[0]

    # pack per-cell inputs: one f32 activation slab + one tiny int32 index slab
    xn = jnp.concatenate([x_basal, noise], axis=-1)              # (B, 160)
    idx = jnp.stack([perts.astype(jnp.int32),
                     cell_types.astype(jnp.int32),
                     batch_ids.astype(jnp.int32)], axis=-1)      # (B, 3)

    # TODO(synk): for realistic batch sizes (>=128 cells) add a batch-tile grid with
    # dimension_semantics=("parallel",) and constant-index weight BlockSpecs (weights
    # resident across tiles; mandatory to use both TCs on v7x); that requires a
    # cross-tile pass for the train-mode BatchNorm statistics.
    out = pl.pallas_call(
        scvi_fused_kernel,
        out_shape=jax.ShapeDtypeStruct((bsz, OUT_W), jnp.float32),
        in_specs=[vmem, vmem, vmem, vmem],
        out_specs=vmem,
    )(xn, idx, params["wslab"], params["consts"])

    # slice the single lane-dense slab back into the module's named outputs
    qz_mean = out[:, _O_QM:_O_QM + N_LATENT]
    qz_std = out[:, _O_QS:_O_QS + N_LATENT]
    z_basal = out[:, _O_ZB:_O_ZB + N_LATENT]
    library = out[:, _O_LIB:_O_LIB + 1]
    z = out[:, _O_Z:_O_Z + N_DEC_IN]
    px_scale = out[:, _O_SCALE:_O_SCALE + N_GENES]
    px_rate = out[:, _O_RATE:_O_RATE + N_GENES]
    px_dropout = out[:, _O_DROP:_O_DROP + N_GENES]

    cut = N_LATENT + N_CELL_TYPE_LATENT
    z_corrected = jnp.concatenate([z[:, :cut], z[:, cut + N_BATCH_LATENT:]], axis=-1)
    px_r = jnp.exp(params["px_r"])   # theta of NegativeBinomial (batch-independent)

    enc_outputs = dict(
        z=z, z_basal=z_basal, z_corrected=z_corrected, library=library,
        qz_mean=qz_mean, qz_std=qz_std,
    )
    dec_outputs = dict(
        px_scale=px_scale, px_rate=px_rate, px_dropout=px_dropout, px_r=px_r,
        pz_loc=jnp.zeros_like(z_basal), pz_scale=jnp.ones_like(z_basal),
    )
    # TODO(synk): n_samples > 1 path (qz.sample((n,)) + library broadcast) not implemented.
    return enc_outputs, dec_outputs


# ----------------------------------- main -----------------------------------
if __name__ == "__main__":
    key = jax.random.PRNGKey(0)
    k_x, k_p, k_c, k_b, k_n = jax.random.split(key, 5)

    params = init_params(seed=0)

    # synthetic non-negative count data (all rows non-empty -> finite library)
    x_basal = jnp.floor(jax.random.uniform(k_x, (B, N_GENES), jnp.float32) * 10.0) + 1.0
    perts = jax.random.randint(k_p, (B,), 0, N_PERTS, dtype=jnp.int32)
    cell_types = jax.random.randint(k_c, (B,), 0, N_CELL_TYPES, dtype=jnp.int32)
    batch_ids = jax.random.randint(k_b, (B,), 0, N_BATCHES, dtype=jnp.int32)
    noise = jax.random.normal(k_n, (B, N_LATENT), jnp.float32)  # reparameterization eps

    enc_outputs, dec_outputs = jax.jit(scvi_forward)(
        params, x_basal, perts, cell_types, batch_ids, noise
    )
    jax.block_until_ready((enc_outputs, dec_outputs))

    all_finite = True
    for d in (enc_outputs, dec_outputs):
        for v in d.values():
            all_finite &= bool(jnp.all(jnp.isfinite(v)))
    assert all_finite, "non-finite values in forward outputs"
    assert enc_outputs["z"].shape == (B, N_DEC_IN)
    assert enc_outputs["z_corrected"].shape == (B, N_DEC_IN - N_BATCH_LATENT)
    assert dec_outputs["px_rate"].shape == (B, N_GENES)
    assert dec_outputs["px_scale"].shape == (B, N_GENES)
    # px_scale rows sum to 1 (exact softmax divide)
    assert bool(jnp.all(jnp.abs(jnp.sum(dec_outputs["px_scale"], axis=-1) - 1.0) < 1e-4))

    print("KERNEL_OK")
</pallas_src>

<mosaic_0001>
module attributes {stable_mosaic.version = 11 : i64} {
  func.func @scvi_fused_kernel(%arg0: memref<8x160xf32, #tpu.memory_space<vmem>>, %arg1: memref<8x3xi32, #tpu.memory_space<vmem>>, %arg2: memref<128x768xbf16, #tpu.memory_space<vmem>>, %arg3: memref<48x256xf32, #tpu.memory_space<vmem>>, %arg4: memref<8x640xf32, #tpu.memory_space<vmem>>) attributes {dimension_semantics = [], scalar_prefetch = 0 : i64, scratch_operands = 0 : i64, tpu.core_type = #tpu.core_type<tc>} {
    %c0 = arith.constant 0 : index
    %c0_0 = arith.constant 0 : index
    %0 = vector.load %arg0[%c0, %c0_0] : memref<8x160xf32, #tpu.memory_space<vmem>>, vector<8x160xf32>
    %1 = vector.extract_strided_slice %0 {offsets = [0, 0], sizes = [8, 128], strides = [1, 1]} : vector<8x160xf32> to vector<8x128xf32>
    %2 = vector.extract_strided_slice %0 {offsets = [0, 128], sizes = [8, 32], strides = [1, 1]} : vector<8x160xf32> to vector<8x32xf32>
    %cst = arith.constant dense<0.000000e+00> : vector<8xf32>
    %3 = vector.multi_reduction <add>, %1, %cst [1] : vector<8x128xf32> to vector<8xf32>
    %4 = vector.shape_cast %3 : vector<8xf32> to vector<8x1xf32>
    %5 = math.log %4 : vector<8x1xf32>
    %c0_1 = arith.constant 0 : index
    %c0_2 = arith.constant 0 : index
    %6 = vector.load %arg3[%c0_1, %c0_2] : memref<48x256xf32, #tpu.memory_space<vmem>>, vector<9x64xf32>
    %c0_3 = arith.constant 0 : index
    %c0_4 = arith.constant 0 : index
    %7 = vector.load %arg2[%c0_3, %c0_4] : memref<128x768xbf16, #tpu.memory_space<vmem>>, vector<128x64xbf16>
    %c0_5 = arith.constant 0 : index
    %c128 = arith.constant 128 : index
    %8 = vector.load %arg2[%c0_5, %c128] : memref<128x768xbf16, #tpu.memory_space<vmem>>, vector<64x64xbf16>
    %c0_6 = arith.constant 0 : index
    %c192 = arith.constant 192 : index
    %9 = vector.load %arg2[%c0_6, %c192] : memref<128x768xbf16, #tpu.memory_space<vmem>>, vector<64x64xbf16>
    %10 = math.log1p %1 : vector<8x128xf32>
    %11 = arith.truncf %10 : vector<8x128xf32> to vector<8x128xbf16>
    %cst_7 = arith.constant dense<0.000000e+00> : vector<8x64xf32>
    %12 = tpu.matmul %11, %7, %cst_7 {dimension_numbers = #tpu.dot_dimension_numbers<[1], [0], [0], [1], [0, 0, 1, 1], [], []>} : vector<8x128xbf16>, vector<128x64xbf16>, vector<8x64xf32> -> vector<8x64xf32>
    %13 = vector.extract_strided_slice %6 {offsets = [0, 0], sizes = [1, 64], strides = [1, 1]} : vector<9x64xf32> to vector<1x64xf32>
    %14 = vector.broadcast %13 : vector<1x64xf32> to vector<8x64xf32>
    %15 = arith.addf %12, %14 : vector<8x64xf32>
    %16 = vector.extract_strided_slice %6 {offsets = [1, 0], sizes = [1, 64], strides = [1, 1]} : vector<9x64xf32> to vector<1x64xf32>
    %17 = vector.extract_strided_slice %6 {offsets = [2, 0], sizes = [1, 64], strides = [1, 1]} : vector<9x64xf32> to vector<1x64xf32>
    %cst_8 = arith.constant dense<0.000000e+00> : vector<64xf32>
    %18 = vector.multi_reduction <add>, %15, %cst_8 [0] : vector<8x64xf32> to vector<64xf32>
    %19 = vector.shape_cast %18 : vector<64xf32> to vector<1x64xf32>
    %cst_9 = arith.constant 8.000000e+00 : f32
    %20 = vector.broadcast %cst_9 : f32 to vector<1x64xf32>
    %21 = arith.divf %19, %20 : vector<1x64xf32>
    %22 = vector.broadcast %21 : vector<1x64xf32> to vector<8x64xf32>
    %23 = arith.subf %15, %22 : vector<8x64xf32>
    %24 = arith.mulf %23, %23 : vector<8x64xf32>
    %cst_10 = arith.constant dense<0.000000e+00> : vector<64xf32>
    %25 = vector.multi_reduction <add>, %24, %cst_10 [0] : vector<8x64xf32> to vector<64xf32>
    %26 = vector.shape_cast %25 : vector<64xf32> to vector<1x64xf32>
    %cst_11 = arith.constant 8.000000e+00 : f32
    %27 = vector.broadcast %cst_11 : f32 to vector<1x64xf32>
    %28 = arith.divf %26, %27 : vector<1x64xf32>
    %29 = vector.broadcast %21 : vector<1x64xf32> to vector<8x64xf32>
    %30 = arith.subf %15, %29 : vector<8x64xf32>
    %cst_12 = arith.constant 9.99999974E-6 : f32
    %31 = vector.broadcast %cst_12 : f32 to vector<1x64xf32>
    %32 = arith.addf %28, %31 : vector<1x64xf32>
    %33 = math.rsqrt %32 : vector<1x64xf32>
    %34 = vector.broadcast %33 : vector<1x64xf32> to vector<8x64xf32>
    %35 = arith.mulf %30, %34 : vector<8x64xf32>
    %36 = vector.broadcast %16 : vector<1x64xf32> to vector<8x64xf32>
    %37 = arith.mulf %35, %36 : vector<8x64xf32>
    %38 = vector.broadcast %17 : vector<1x64xf32> to vector<8x64xf32>
    %39 = arith.addf %37, %38 : vector<8x64xf32>
    %cst_13 = arith.constant 0.000000e+00 : f32
    %40 = vector.broadcast %cst_13 : f32 to vector<8x64xf32>
    %41 = arith.maximumf %39, %40 : vector<8x64xf32>
    %42 = arith.truncf %41 : vector<8x64xf32> to vector<8x64xbf16>
    %cst_14 = arith.constant dense<0.000000e+00> : vector<8x64xf32>
    %43 = tpu.matmul %42, %8, %cst_14 {dimension_numbers = #tpu.dot_dimension_numbers<[1], [0], [0], [1], [0, 0, 1, 1], [], []>} : vector<8x64xbf16>, vector<64x64xbf16>, vector<8x64xf32> -> vector<8x64xf32>
    %44 = vector.extract_strided_slice %6 {offsets = [3, 0], sizes = [1, 64], strides = [1, 1]} : vector<9x64xf32> to vector<1x64xf32>
    %45 = vector.broadcast %44 : vector<1x64xf32> to vector<8x64xf32>
    %46 = arith.addf %43, %45 : vector<8x64xf32>
    %47 = vector.extract_strided_slice %6 {offsets = [4, 0], sizes = [1, 64], strides = [1, 1]} : vector<9x64xf32> to vector<1x64xf32>
    %48 = vector.extract_strided_slice %6 {offsets = [5, 0], sizes = [1, 64], strides = [1, 1]} : vector<9x64xf32> to vector<1x64xf32>
    %cst_15 = arith.constant dense<0.000000e+00> : vector<64xf32>
    %49 = vector.multi_reduction <add>, %46, %cst_15 [0] : vector<8x64xf32> to vector<64xf32>
    %50 = vector.shape_cast %49 : vector<64xf32> to vector<1x64xf32>
    %cst_16 = arith.constant 8.000000e+00 : f32
    %51 = vector.broadcast %cst_16 : f32 to vector<1x64xf32>
    %52 = arith.divf %50, %51 : vector<1x64xf32>
    %53 = vector.broadcast %52 : vector<1x64xf32> to vector<8x64xf32>
    %54 = arith.subf %46, %53 : vector<8x64xf32>
    %55 = arith.mulf %54, %54 : vector<8x64xf32>
    %cst_17 = arith.constant dense<0.000000e+00> : vector<64xf32>
    %56 = vector.multi_reduction <add>, %55, %cst_17 [0] : vector<8x64xf32> to vector<64xf32>
    %57 = vector.shape_cast %56 : vector<64xf32> to vector<1x64xf32>
    %cst_18 = arith.constant 8.000000e+00 : f32
    %58 = vector.broadcast %cst_18 : f32 to vector<1x64xf32>
    %59 = arith.divf %57, %58 : vector<1x64xf32>
    %60 = vector.broadcast %52 : vector<1x64xf32> to vector<8x64xf32>
    %61 = arith.subf %46, %60 : vector<8x64xf32>
    %cst_19 = arith.constant 9.99999974E-6 : f32
    %62 = vector.broadcast %cst_19 : f32 to vector<1x64xf32>
    %63 = arith.addf %59, %62 : vector<1x64xf32>
    %64 = math.rsqrt %63 : vector<1x64xf32>
    %65 = vector.broadcast %64 : vector<1x64xf32> to vector<8x64xf32>
    %66 = arith.mulf %61, %65 : vector<8x64xf32>
    %67 = vector.broadcast %47 : vector<1x64xf32> to vector<8x64xf32>
    %68 = arith.mulf %66, %67 : vector<8x64xf32>
    %69 = vector.broadcast %48 : vector<1x64xf32> to vector<8x64xf32>
    %70 = arith.addf %68, %69 : vector<8x64xf32>
    %cst_20 = arith.constant 0.000000e+00 : f32
    %71 = vector.broadcast %cst_20 : f32 to vector<8x64xf32>
    %72 = arith.maximumf %70, %71 : vector<8x64xf32>
    %73 = arith.truncf %72 : vector<8x64xf32> to vector<8x64xbf16>
    %cst_21 = arith.constant dense<0.000000e+00> : vector<8x64xf32>
    %74 = tpu.matmul %73, %9, %cst_21 {dimension_numbers = #tpu.dot_dimension_numbers<[1], [0], [0], [1], [0, 0, 1, 1], [], []>} : vector<8x64xbf16>, vector<64x64xbf16>, vector<8x64xf32> -> vector<8x64xf32>
    %75 = vector.extract_strided_slice %6 {offsets = [6, 0], sizes = [1, 64], strides = [1, 1]} : vector<9x64xf32> to vector<1x64xf32>
    %76 = vector.broadcast %75 : vector<1x64xf32> to vector<8x64xf32>
    %77 = arith.addf %74, %76 : vector<8x64xf32>
    %78 = vector.extract_strided_slice %6 {offsets = [7, 0], sizes = [1, 64], strides = [1, 1]} : vector<9x64xf32> to vector<1x64xf32>
    %79 = vector.extract_strided_slice %6 {offsets = [8, 0], sizes = [1, 64], strides = [1, 1]} : vector<9x64xf32> to vector<1x64xf32>
    %cst_22 = arith.constant dense<0.000000e+00> : vector<64xf32>
    %80 = vector.multi_reduction <add>, %77, %cst_22 [0] : vector<8x64xf32> to vector<64xf32>
    %81 = vector.shape_cast %80 : vector<64xf32> to vector<1x64xf32>
    %cst_23 = arith.constant 8.000000e+00 : f32
    %82 = vector.broadcast %cst_23 : f32 to vector<1x64xf32>
    %83 = arith.divf %81, %82 : vector<1x64xf32>
    %84 = vector.broadcast %83 : vector<1x64xf32> to vector<8x64xf32>
    %85 = arith.subf %77, %84 : vector<8x64xf32>
    %86 = arith.mulf %85, %85 : vector<8x64xf32>
    %cst_24 = arith.constant dense<0.000000e+00> : vector<64xf32>
    %87 = vector.multi_reduction <add>, %86, %cst_24 [0] : vector<8x64xf32> to vector<64xf32>
    %88 = vector.shape_cast %87 : vector<64xf32> to vector<1x64xf32>
    %cst_25 = arith.constant 8.000000e+00 : f32
    %89 = vector.broadcast %cst_25 : f32 to vector<1x64xf32>
    %90 = arith.divf %88, %89 : vector<1x64xf32>
    %91 = vector.broadcast %83 : vector<1x64xf32> to vector<8x64xf32>
    %92 = arith.subf %77, %91 : vector<8x64xf32>
    %cst_26 = arith.constant 9.99999974E-6 : f32
    %93 = vector.broadcast %cst_26 : f32 to vector<1x64xf32>
    %94 = arith.addf %90, %93 : vector<1x64xf32>
    %95 = math.rsqrt %94 : vector<1x64xf32>
    %96 = vector.broadcast %95 : vector<1x64xf32> to vector<8x64xf32>
    %97 = arith.mulf %92, %96 : vector<8x64xf32>
    %98 = vector.broadcast %78 : vector<1x64xf32> to vector<8x64xf32>
    %99 = arith.mulf %97, %98 : vector<8x64xf32>
    %100 = vector.broadcast %79 : vector<1x64xf32> to vector<8x64xf32>
    %101 = arith.addf %99, %100 : vector<8x64xf32>
    %cst_27 = arith.constant 0.000000e+00 : f32
    %102 = vector.broadcast %cst_27 : f32 to vector<8x64xf32>
    %103 = arith.maximumf %101, %102 : vector<8x64xf32>
    %104 = arith.truncf %103 : vector<8x64xf32> to vector<8x64xbf16>
    %c0_28 = arith.constant 0 : index
    %c256 = arith.constant 256 : index
    %105 = vector.load %arg2[%c0_28, %c256] : memref<128x768xbf16, #tpu.memory_space<vmem>>, vector<64x64xbf16>
    %cst_29 = arith.constant dense<0.000000e+00> : vector<8x64xf32>
    %106 = tpu.matmul %104, %105, %cst_29 {dimension_numbers = #tpu.dot_dimension_numbers<[1], [0], [0], [1], [0, 0, 1, 1], [], []>} : vector<8x64xbf16>, vector<64x64xbf16>, vector<8x64xf32> -> vector<8x64xf32>
    %c18 = arith.constant 18 : index
    %c0_30 = arith.constant 0 : index
    %107 = vector.load %arg3[%c18, %c0_30] : memref<48x256xf32, #tpu.memory_space<vmem>>, vector<1x64xf32>
    %108 = vector.broadcast %107 : vector<1x64xf32> to vector<8x64xf32>
    %109 = arith.addf %106, %108 : vector<8x64xf32>
    %110 = vector.extract_strided_slice %109 {offsets = [0, 0], sizes = [8, 32], strides = [1, 1]} : vector<8x64xf32> to vector<8x32xf32>
    %111 = vector.extract_strided_slice %109 {offsets = [0, 32], sizes = [8, 32], strides = [1, 1]} : vector<8x64xf32> to vector<8x32xf32>
    %cst_31 = arith.constant 0.000000e+00 : f32
    %112 = vector.broadcast %cst_31 : f32 to vector<8x32xf32>
    %113 = arith.maximumf %111, %112 : vector<8x32xf32>
    %114 = vector.broadcast %cst_31 : f32 to vector<8x32xf32>
    %115 = arith.subf %111, %114 : vector<8x32xf32>
    %116 = arith.cmpf one, %115, %115 : vector<8x32xf32>
    %117 = vector.broadcast %cst_31 : f32 to vector<8x32xf32>
    %118 = arith.addf %111, %117 : vector<8x32xf32>
    %119 = math.absf %115 : vector<8x32xf32>
    %cst_32 = arith.constant 0.000000e+00 : f32
    %120 = vector.broadcast %cst_32 : f32 to vector<8x32xf32>
    %121 = arith.subf %120, %119 : vector<8x32xf32>
    %122 = math.exp %121 : vector<8x32xf32>
    %123 = math.log1p %122 : vector<8x32xf32>
    %124 = arith.addf %113, %123 : vector<8x32xf32>
    %125 = arith.select %116, %118, %124 : vector<8x32xi1>, vector<8x32xf32>
    %cst_33 = arith.constant 9.99999974E-5 : f32
    %126 = vector.broadcast %cst_33 : f32 to vector<8x32xf32>
    %127 = arith.addf %125, %126 : vector<8x32xf32>
    %128 = math.sqrt %127 : vector<8x32xf32>
    %129 = arith.mulf %128, %2 : vector<8x32xf32>
    %130 = arith.addf %110, %129 : vector<8x32xf32>
    %c0_34 = arith.constant 0 : index
    %c0_35 = arith.constant 0 : index
    %131 = vector.load %arg1[%c0_34, %c0_35] : memref<8x3xi32, #tpu.memory_space<vmem>>, vector<8x3xi32>
    %132 = tpu.iota {dimensions = array<i32: 1>} : vector<8x24xi32>
    %133 = vector.extract_strided_slice %131 {offsets = [0, 1], sizes = [8, 1], strides = [1, 1]} : vector<8x3xi32> to vector<8x1xi32>
    %134 = vector.broadcast %133 : vector<8x1xi32> to vector<8x24xi32>
    %135 = arith.cmpi eq, %132, %134 : vector<8x24xi32>
    %136 = vector.extract_strided_slice %131 {offsets = [0, 2], sizes = [8, 1], strides = [1, 1]} : vector<8x3xi32> to vector<8x1xi32>
    %c5_i32 = arith.constant 5 : i32
    %137 = vector.broadcast %c5_i32 : i32 to vector<8x1xi32>
    %138 = arith.addi %136, %137 : vector<8x1xi32>
    %139 = vector.broadcast %138 : vector<8x1xi32> to vector<8x24xi32>
    %140 = arith.cmpi eq, %132, %139 : vector<8x24xi32>
    %141 = arith.ori %135, %140 : vector<8x24xi1>
    %142 = vector.extract_strided_slice %131 {offsets = [0, 0], sizes = [8, 1], strides = [1, 1]} : vector<8x3xi32> to vector<8x1xi32>
    %c5_i32_36 = arith.constant 5 : i32
    %143 = vector.broadcast %c5_i32_36 : i32 to vector<8x1xi32>
    %144 = arith.addi %142, %143 : vector<8x1xi32>
    %c3_i32 = arith.constant 3 : i32
    %145 = vector.broadcast %c3_i32 : i32 to vector<8x1xi32>
    %146 = arith.addi %144, %145 : vector<8x1xi32>
    %147 = vector.broadcast %146 : vector<8x1xi32> to vector<8x24xi32>
    %148 = arith.cmpi eq, %132, %147 : vector<8x24xi32>
    %149 = arith.ori %141, %148 : vector<8x24xi1>
    %150 = arith.extui %149 : vector<8x24xi1> to vector<8x24xi32>
    %151 = arith.sitofp %150 : vector<8x24xi32> to vector<8x24xf32>
    %c24 = arith.constant 24 : index
    %c0_37 = arith.constant 0 : index
    %152 = vector.load %arg3[%c24, %c0_37] : memref<48x256xf32, #tpu.memory_space<vmem>>, vector<24x96xf32>
    %cst_38 = arith.constant dense<0.000000e+00> : vector<8x96xf32>
    %153 = tpu.matmul %151, %152, %cst_38 {dimension_numbers = #tpu.dot_dimension_numbers<[1], [0], [0], [1], [0, 0, 1, 1], [], []>} : vector<8x24xf32>, vector<24x96xf32>, vector<8x96xf32> -> vector<8x96xf32>
    %154 = tpu.concatenate %130, %153 in 1 : vector<8x32xf32>, vector<8x96xf32> -> vector<8x128xf32>
    %c9 = arith.constant 9 : index
    %c0_39 = arith.constant 0 : index
    %155 = vector.load %arg3[%c9, %c0_39] : memref<48x256xf32, #tpu.memory_space<vmem>>, vector<9x64xf32>
    %c0_40 = arith.constant 0 : index
    %c64 = arith.constant 64 : index
    %156 = vector.load %arg2[%c0_40, %c64] : memref<128x768xbf16, #tpu.memory_space<vmem>>, vector<128x64xbf16>
    %c0_41 = arith.constant 0 : index
    %c320 = arith.constant 320 : index
    %157 = vector.load %arg2[%c0_41, %c320] : memref<128x768xbf16, #tpu.memory_space<vmem>>, vector<64x64xbf16>
    %c0_42 = arith.constant 0 : index
    %c384 = arith.constant 384 : index
    %158 = vector.load %arg2[%c0_42, %c384] : memref<128x768xbf16, #tpu.memory_space<vmem>>, vector<64x64xbf16>
    %159 = arith.truncf %154 : vector<8x128xf32> to vector<8x128xbf16>
    %cst_43 = arith.constant dense<0.000000e+00> : vector<8x64xf32>
    %160 = tpu.matmul %159, %156, %cst_43 {dimension_numbers = #tpu.dot_dimension_numbers<[1], [0], [0], [1], [0, 0, 1, 1], [], []>} : vector<8x128xbf16>, vector<128x64xbf16>, vector<8x64xf32> -> vector<8x64xf32>
    %161 = vector.extract_strided_slice %155 {offsets = [0, 0], sizes = [1, 64], strides = [1, 1]} : vector<9x64xf32> to vector<1x64xf32>
    %162 = vector.broadcast %161 : vector<1x64xf32> to vector<8x64xf32>
    %163 = arith.addf %160, %162 : vector<8x64xf32>
    %164 = vector.extract_strided_slice %155 {offsets = [1, 0], sizes = [1, 64], strides = [1, 1]} : vector<9x64xf32> to vector<1x64xf32>
    %165 = vector.extract_strided_slice %155 {offsets = [2, 0], sizes = [1, 64], strides = [1, 1]} : vector<9x64xf32> to vector<1x64xf32>
    %cst_44 = arith.constant dense<0.000000e+00> : vector<64xf32>
    %166 = vector.multi_reduction <add>, %163, %cst_44 [0] : vector<8x64xf32> to vector<64xf32>
    %167 = vector.shape_cast %166 : vector<64xf32> to vector<1x64xf32>
    %cst_45 = arith.constant 8.000000e+00 : f32
    %168 = vector.broadcast %cst_45 : f32 to vector<1x64xf32>
    %169 = arith.divf %167, %168 : vector<1x64xf32>
    %170 = vector.broadcast %169 : vector<1x64xf32> to vector<8x64xf32>
    %171 = arith.subf %163, %170 : vector<8x64xf32>
    %172 = arith.mulf %171, %171 : vector<8x64xf32>
    %cst_46 = arith.constant dense<0.000000e+00> : vector<64xf32>
    %173 = vector.multi_reduction <add>, %172, %cst_46 [0] : vector<8x64xf32> to vector<64xf32>
    %174 = vector.shape_cast %173 : vector<64xf32> to vector<1x64xf32>
    %cst_47 = arith.constant 8.000000e+00 : f32
    %175 = vector.broadcast %cst_47 : f32 to vector<1x64xf32>
    %176 = arith.divf %174, %175 : vector<1x64xf32>
    %177 = vector.broadcast %169 : vector<1x64xf32> to vector<8x64xf32>
    %178 = arith.subf %163, %177 : vector<8x64xf32>
    %cst_48 = arith.constant 9.99999974E-6 : f32
    %179 = vector.broadcast %cst_48 : f32 to vector<1x64xf32>
    %180 = arith.addf %176, %179 : vector<1x64xf32>
    %181 = math.rsqrt %180 : vector<1x64xf32>
    %182 = vector.broadcast %181 : vector<1x64xf32> to vector<8x64xf32>
    %183 = arith.mulf %178, %182 : vector<8x64xf32>
    %184 = vector.broadcast %164 : vector<1x64xf32> to vector<8x64xf32>
    %185 = arith.mulf %183, %184 : vector<8x64xf32>
    %186 = vector.broadcast %165 : vector<1x64xf32> to vector<8x64xf32>
    %187 = arith.addf %185, %186 : vector<8x64xf32>
    %cst_49 = arith.constant 0.000000e+00 : f32
    %188 = vector.broadcast %cst_49 : f32 to vector<8x64xf32>
    %189 = arith.maximumf %187, %188 : vector<8x64xf32>
    %190 = arith.truncf %189 : vector<8x64xf32> to vector<8x64xbf16>
    %cst_50 = arith.constant dense<0.000000e+00> : vector<8x64xf32>
    %191 = tpu.matmul %190, %157, %cst_50 {dimension_numbers = #tpu.dot_dimension_numbers<[1], [0], [0], [1], [0, 0, 1, 1], [], []>} : vector<8x64xbf16>, vector<64x64xbf16>, vector<8x64xf32> -> vector<8x64xf32>
    %192 = vector.extract_strided_slice %155 {offsets = [3, 0], sizes = [1, 64], strides = [1, 1]} : vector<9x64xf32> to vector<1x64xf32>
    %193 = vector.broadcast %192 : vector<1x64xf32> to vector<8x64xf32>
    %194 = arith.addf %191, %193 : vector<8x64xf32>
    %195 = vector.extract_strided_slice %155 {offsets = [4, 0], sizes = [1, 64], strides = [1, 1]} : vector<9x64xf32> to vector<1x64xf32>
    %196 = vector.extract_strided_slice %155 {offsets = [5, 0], sizes = [1, 64], strides = [1, 1]} : vector<9x64xf32> to vector<1x64xf32>
    %cst_51 = arith.constant dense<0.000000e+00> : vector<64xf32>
    %197 = vector.multi_reduction <add>, %194, %cst_51 [0] : vector<8x64xf32> to vector<64xf32>
    %198 = vector.shape_cast %197 : vector<64xf32> to vector<1x64xf32>
    %cst_52 = arith.constant 8.000000e+00 : f32
    %199 = vector.broadcast %cst_52 : f32 to vector<1x64xf32>
    %200 = arith.divf %198, %199 : vector<1x64xf32>
    %201 = vector.broadcast %200 : vector<1x64xf32> to vector<8x64xf32>
    %202 = arith.subf %194, %201 : vector<8x64xf32>
    %203 = arith.mulf %202, %202 : vector<8x64xf32>
    %cst_53 = arith.constant dense<0.000000e+00> : vector<64xf32>
    %204 = vector.multi_reduction <add>, %203, %cst_53 [0] : vector<8x64xf32> to vector<64xf32>
    %205 = vector.shape_cast %204 : vector<64xf32> to vector<1x64xf32>
    %cst_54 = arith.constant 8.000000e+00 : f32
    %206 = vector.broadcast %cst_54 : f32 to vector<1x64xf32>
    %207 = arith.divf %205, %206 : vector<1x64xf32>
    %208 = vector.broadcast %200 : vector<1x64xf32> to vector<8x64xf32>
    %209 = arith.subf %194, %208 : vector<8x64xf32>
    %cst_55 = arith.constant 9.99999974E-6 : f32
    %210 = vector.broadcast %cst_55 : f32 to vector<1x64xf32>
    %211 = arith.addf %207, %210 : vector<1x64xf32>
    %212 = math.rsqrt %211 : vector<1x64xf32>
    %213 = vector.broadcast %212 : vector<1x64xf32> to vector<8x64xf32>
    %214 = arith.mulf %209, %213 : vector<8x64xf32>
    %215 = vector.broadcast %195 : vector<1x64xf32> to vector<8x64xf32>
    %216 = arith.mulf %214, %215 : vector<8x64xf32>
    %217 = vector.broadcast %196 : vector<1x64xf32> to vector<8x64xf32>
    %218 = arith.addf %216, %217 : vector<8x64xf32>
    %cst_56 = arith.constant 0.000000e+00 : f32
    %219 = vector.broadcast %cst_56 : f32 to vector<8x64xf32>
    %220 = arith.maximumf %218, %219 : vector<8x64xf32>
    %221 = arith.truncf %220 : vector<8x64xf32> to vector<8x64xbf16>
    %cst_57 = arith.constant dense<0.000000e+00> : vector<8x64xf32>
    %222 = tpu.matmul %221, %158, %cst_57 {dimension_numbers = #tpu.dot_dimension_numbers<[1], [0], [0], [1], [0, 0, 1, 1], [], []>} : vector<8x64xbf16>, vector<64x64xbf16>, vector<8x64xf32> -> vector<8x64xf32>
    %223 = vector.extract_strided_slice %155 {offsets = [6, 0], sizes = [1, 64], strides = [1, 1]} : vector<9x64xf32> to vector<1x64xf32>
    %224 = vector.broadcast %223 : vector<1x64xf32> to vector<8x64xf32>
    %225 = arith.addf %222, %224 : vector<8x64xf32>
    %226 = vector.extract_strided_slice %155 {offsets = [7, 0], sizes = [1, 64], strides = [1, 1]} : vector<9x64xf32> to vector<1x64xf32>
    %227 = vector.extract_strided_slice %155 {offsets = [8, 0], sizes = [1, 64], strides = [1, 1]} : vector<9x64xf32> to vector<1x64xf32>
    %cst_58 = arith.constant dense<0.000000e+00> : vector<64xf32>
    %228 = vector.multi_reduction <add>, %225, %cst_58 [0] : vector<8x64xf32> to vector<64xf32>
    %229 = vector.shape_cast %228 : vector<64xf32> to vector<1x64xf32>
    %cst_59 = arith.constant 8.000000e+00 : f32
    %230 = vector.broadcast %cst_59 : f32 to vector<1x64xf32>
    %231 = arith.divf %229, %230 : vector<1x64xf32>
    %232 = vector.broadcast %231 : vector<1x64xf32> to vector<8x64xf32>
    %233 = arith.subf %225, %232 : vector<8x64xf32>
    %234 = arith.mulf %233, %233 : vector<8x64xf32>
    %cst_60 = arith.constant dense<0.000000e+00> : vector<64xf32>
    %235 = vector.multi_reduction <add>, %234, %cst_60 [0] : vector<8x64xf32> to vector<64xf32>
    %236 = vector.shape_cast %235 : vector<64xf32> to vector<1x64xf32>
    %cst_61 = arith.constant 8.000000e+00 : f32
    %237 = vector.broadcast %cst_61 : f32 to vector<1x64xf32>
    %238 = arith.divf %236, %237 : vector<1x64xf32>
    %239 = vector.broadcast %231 : vector<1x64xf32> to vector<8x64xf32>
    %240 = arith.subf %225, %239 : vector<8x64xf32>
    %cst_62 = arith.constant 9.99999974E-6 : f32
    %241 = vector.broadcast %cst_62 : f32 to vector<1x64xf32>
    %242 = arith.addf %238, %241 : vector<1x64xf32>
    %243 = math.rsqrt %242 : vector<1x64xf32>
    %244 = vector.broadcast %243 : vector<1x64xf32> to vector<8x64xf32>
    %245 = arith.mulf %240, %244 : vector<8x64xf32>
    %246 = vector.broadcast %226 : vector<1x64xf32> to vector<8x64xf32>
    %247 = arith.mulf %245, %246 : vector<8x64xf32>
    %248 = vector.broadcast %227 : vector<1x64xf32> to vector<8x64xf32>
    %249 = arith.addf %247, %248 : vector<8x64xf32>
    %cst_63 = arith.constant 0.000000e+00 : f32
    %250 = vector.broadcast %cst_63 : f32 to vector<8x64xf32>
    %251 = arith.maximumf %249, %250 : vector<8x64xf32>
    %252 = arith.truncf %251 : vector<8x64xf32> to vector<8x64xbf16>
    %c0_64 = arith.constant 0 : index
    %c448 = arith.constant 448 : index
    %253 = vector.load %arg2[%c0_64, %c448] : memref<128x768xbf16, #tpu.memory_space<vmem>>, vector<64x256xbf16>
    %cst_65 = arith.constant dense<0.000000e+00> : vector<8x256xf32>
    %254 = tpu.matmul %252, %253, %cst_65 {dimension_numbers = #tpu.dot_dimension_numbers<[1], [0], [0], [1], [0, 0, 1, 1], [], []>} : vector<8x64xbf16>, vector<64x256xbf16>, vector<8x256xf32> -> vector<8x256xf32>
    %c19 = arith.constant 19 : index
    %c0_66 = arith.constant 0 : index
    %255 = vector.load %arg3[%c19, %c0_66] : memref<48x256xf32, #tpu.memory_space<vmem>>, vector<1x256xf32>
    %256 = vector.broadcast %255 : vector<1x256xf32> to vector<8x256xf32>
    %257 = arith.addf %254, %256 : vector<8x256xf32>
    %258 = vector.extract_strided_slice %257 {offsets = [0, 0], sizes = [8, 128], strides = [1, 1]} : vector<8x256xf32> to vector<8x128xf32>
    %259 = vector.extract_strided_slice %257 {offsets = [0, 128], sizes = [8, 128], strides = [1, 1]} : vector<8x256xf32> to vector<8x128xf32>
    %cst_67 = arith.constant dense<0xFF800000> : vector<8xf32>
    %260 = vector.multi_reduction <maximumf>, %258, %cst_67 [1] : vector<8x128xf32> to vector<8xf32>
    %261 = vector.shape_cast %260 : vector<8xf32> to vector<8x1xf32>
    %262 = vector.broadcast %261 : vector<8x1xf32> to vector<8x128xf32>
    %263 = arith.subf %258, %262 : vector<8x128xf32>
    %264 = math.exp %263 : vector<8x128xf32>
    %cst_68 = arith.constant dense<0.000000e+00> : vector<8xf32>
    %265 = vector.multi_reduction <add>, %264, %cst_68 [1] : vector<8x128xf32> to vector<8xf32>
    %266 = vector.shape_cast %265 : vector<8xf32> to vector<8x1xf32>
    %267 = vector.broadcast %266 : vector<8x1xf32> to vector<8x128xf32>
    %268 = arith.divf %264, %267 : vector<8x128xf32>
    %269 = vector.broadcast %4 : vector<8x1xf32> to vector<8x128xf32>
    %270 = arith.mulf %269, %268 : vector<8x128xf32>
    %271 = vector.shape_cast %5 : vector<8x1xf32> to vector<8x1xf32>
    %272 = vector.broadcast %271 : vector<8x1xf32> to vector<8x32xf32>
    %273 = tpu.concatenate %110, %128, %130, %272, %154, %268, %270, %259 in 1 : vector<8x32xf32>, vector<8x32xf32>, vector<8x32xf32>, vector<8x32xf32>, vector<8x128xf32>, vector<8x128xf32>, vector<8x128xf32>, vector<8x128xf32> -> vector<8x640xf32>
    %c0_69 = arith.constant 0 : index
    %c0_70 = arith.constant 0 : index
    %274 = vector.load %arg4[%c0_69, %c0_70] : memref<8x640xf32, #tpu.memory_space<vmem>>, vector<8x640xf32>
    tpu.vector_store %arg4[%c0_69, %c0_70], %273 {strides = array<i32>} : memref<8x640xf32, #tpu.memory_space<vmem>>, vector<8x640xf32>,
    return
  }
}

</mosaic_0001>

<bundles_post_ra>
// kernel: scvi_forward.1
= control target key start
LH: loop header
LB: loop body
LE: loop exit
PB: predicated region body
PF: predicated region fallthrough
CT: control target
= control target key end

     0   :  { %9 = vsyncpa [#allocation3], 0  ;;  %s1413_s15 = smov [#allocation2]   ;;  %s1756_s0 = inlined_call_operand.vmem [shape: f32[8,160], index: 0, kind: input, shape index: {}]   ;;  %s1757_s1 = inlined_call_operand.vmem [shape: s32[8,3], index: 1, kind: input, shape index: {}]   ;;  %s1758_s2 = inlined_call_operand.hbm [shape: bf16[128,768], index: 2, kind: input, shape index: {}]   ;;  %s1759_s3 = inlined_call_operand.vmem [shape: f32[48,256], index: 3, kind: input, shape index: {}]   ;;  %s1760_s4 = inlined_call_operand.vmem [shape: f32[8,640], index: 4, kind: output, shape index: {}]  }
   0x1   :  { %s19_s16 = sshll.u32 %s1413_s15, 4  ;;  %s20_s16 = int_to_ptr.vmem [resolvable:$true] %s19_s16 }
   0x2   :  { %s1399_s17 = scalar_lea.vmem %s20_s16, 6144  ;;  %p1404_p1 = scmp.lt.s32.totalorder %s20_s16, %s20_s16 }
   0x3   :  { %p1400_p0 = scmp.ne.s32.totalorder %s20_s16, %s1399_s17  ;;  %p1405_p2 = scmp.lt.s32.totalorder %s1399_s17, %s1399_s17 }
   0x5   :  { %p1406_p3 = por %p1405_p2, %p1404_p1 }
   0x7   :  { %p1407_p4 = pnand %p1406_p3, %p1400_p0 }
   0x9   :  { %1410 = shalt.err (!%p1407_p4)
}
   0xa   :  { %s1414_s18 = smov 384   ;;  %s1415_s19 = smov 24  }
   0xb   :  { %25 = dma.hbm_to_vmem [thread:$0]  %s1758_s2, 6144, %s20_s16, [#allocation3], %s1414_s18, %s1414_s18, %s1415_s19  }
   0xc   :  { %1411 = dma.done.wait [#allocation3], 6144  }
   0xd   :  { %1412 = vsyncadd [#allocation3], 4294961152  ;;  %v1416_v0 = vmov 0.0   ;;  %vm1417_vm0 = vmmov 0   ;;  %v1458_v1 = vld [vmem:[#allocation2 + $0x150] ss:$24 sps:$4 sm:$0xff]   ;;  %v74_v23 = vlaneseq }
   0xe   :  { %1204 = vmatprep.subr.bf16.mxu0 %v1416_v0  ;;  %1220 = vmatprep.mubr.msk.bf16.mxu0 %vm1417_vm0, %v1416_v0  ;;  %v1461_v2 = vld [vmem:[#allocation2 + $0x120] ss:$24 sps:$4 sm:$0xff]   ;;  %v1465_v3 = vld [vmem:[#allocation2 + $0xf0] ss:$24 sps:$4 sm:$0xff]   ;;  %v1336_v19 = vld [vmem:[#allocation2 + $0x94] ss:$24 sps:$4 sm:$0xff]  }
   0xf   :  { %1224 = vmatprep.subr.bf16.mxu1 %v1416_v0  ;;  %1232 = vmatprep.mubr.msk.bf16.mxu1 %vm1417_vm0, %v1416_v0  ;;  %v32_v4 = vld [vmem:[%s1756_s0] sm:$0xff]  ;;  %v1475_v8 = vld [vmem:[#allocation2 + $0x90] ss:$24 sps:$4 sm:$0xff]   ;;  %v1338_v21 = vld [vmem:[#allocation2 + $0x34] ss:$24 sps:$4 sm:$0xff]   ;;  %s1418_s23 = smov 64  }
  0x10   :  { %1205 = vmatpush3.bf16.msra.mxu0 %v1458_v1  ;;  %v1471_v5 = vld [vmem:[#allocation2 + $0xc0] ss:$24 sps:$4 sm:$0xff]   ;;  %v64_v6 = vadd.f32 1.0, %v32_v4  ;;  %v67_v7 = vmul.f32 -0.5, %v32_v4  ;;  %v1483_v11 = vld [vmem:[#allocation2 + $0x30] ss:$24 sps:$4 sm:$0xff]   ;;  %1225 = vmatpush3.bf16.msra.mxu1 %v1336_v19 }
  0x11   :  { %1206 = vmatprep.subr.bf16.mxu0 %v1416_v0  ;;  %v1479_v9 = vld [vmem:[#allocation2 + $0x60] ss:$24 sps:$4 sm:$0xff]   ;;  %v70_v12 = vand.u32 2147483647, %v32_v4  ;;  %1226 = vmatprep.subr.bf16.mxu1 %v1416_v0  ;;  %v1337_v20 = vld [vmem:[#allocation2 + $0x64] ss:$24 sps:$4 sm:$0xff]  }
  0x12   :  { %1364 = vlog2.f32 %v64_v6  ;;  %v68_v10 = vadd.f32 1.0, %v67_v7  ;;  %v1488_v16 = vld [vmem:[#allocation2] ss:$24 sps:$4 sm:$0xff]   ;;  %v1339_v22 = vld [vmem:[#allocation2 + $0x4] ss:$24 sps:$4 sm:$0xff]   ;;  %315 = vrot.lane.b32.xlu0 %v1336_v19, %s1418_s23  ;;  %311 = vrot.lane.b32.xlu1 %v1338_v21, %s1418_s23  ;;  %v1504_v24 = vshrl.u32 %v74_v23, 7 }
  0x13   :  { %vm71_vm1 = vcmp.lt.f32.partialorder %v70_v12, 0.0004427343  ;;  %v1512_v26 = vld [vmem:[%s1759_s3] sm:$0xff]  ;;  %vm166_vm2 = vcmask 523264   ;;  %s1422_s9 = smov 32   ;;  %vm533_vm7 = vcmask 195584  }
  0x14   :  { %1207 = vmatpush3.bf16.msra.mxu0 %v1461_v2  ;;  %v69_v13 = vmul.f32 %v68_v10, %v32_v4  ;;  %1227 = vmatpush3.bf16.msra.mxu1 %v1337_v20  ;;  %v1507_v25 = vsub.s32 0, %v1504_v24  ;;  %v1519_v52 = vsub.s32 1, %v1504_v24  ;;  %v196_v53 = vsub.s32 2, %v1504_v24  ;;  %v509_v7 = vld [vmem:[%s1757_s1] sm:$0xff]  ;;  %s1423_s14 = smov 96  }
  0x15   :  { %1208 = vmatprep.subr.bf16.mxu0 %v1416_v0  ;;  %1228 = vmatprep.subr.bf16.mxu1 %v1416_v0  ;;  %v1419_v10 = vmov 2   ;;  %v516_v12 = vadd.s32 5, %v509_v7  ;;  %vm611_vm13 = vcmask 261120   ;;  %vm1103_vm14 = vcmask 785408  }
  0x16   :  { %313 = vrot.lane.b32.xlu0 %v1337_v20, %s1418_s23  ;;  %309 = vrot.lane.b32.xlu1 %v1339_v22, %s1418_s23  ;;  %v77_v27 = vrot.slane %v1512_v26, %v1507_v25  ;;  %v192_v54 = vrot.slane %v1512_v26, %v1519_v52  ;;  %v197_v57 = vrot.slane %v1512_v26, %v196_v53 }
  0x17   :  { %1325 = vset.pattern.permute.xlu1 %v1419_v10  ;;  %v307_v10 = vsub.s32 6, %v1504_v24 }
  0x18   :  { %1209 = vmatpush3.bf16.msra.mxu0 %v1465_v3  ;;  %1229 = vmatpush3.bf16.msra.mxu1 %v1338_v21 }
  0x19   :  { %1210 = vmatprep.subr.bf16.mxu0 %v1416_v0  ;;  %1230 = vmatprep.subr.bf16.mxu1 %v1416_v0 }
  0x1a   :  { %518 = vperm.xlu1 %1325, %v516_v12  }
  0x1c   :  { %1211 = vmatpush3.bf16.msra.mxu0 %v1471_v5  ;;  %1231 = vmatpush3.bf16.msra.mxu1 %v1339_v22 }
  0x1d   :  { %1212 = vmatprep.subr.bf16.mxu0 %v1416_v0  ;;  %1236 = vmatprep.subr.bf16.mxu1 %v1416_v0 }
  0x1f   :  { %v1365_v14 = vpop.eup %1364 }
  0x20   :  { %1213 = vmatpush3.bf16.msra.mxu0 %v1475_v8  ;;  %v66_v15 = vmul.f32 0.6931472, %v1365_v14  ;;  %v522_v14 = vadd.s32 3, %v516_v12 }
  0x21   :  { %1214 = vmatprep.subr.bf16.mxu0 %v1416_v0 }
  0x22   :  { %v72_v17 = vsel %vm71_vm1, %v69_v13, %v66_v15  ;;  %v1420_v13 = vmov 1   ;;  %v1421_v15 = vmov 0  }
  0x23   :  { %v73_v18 = vpack.c.bf16 %v72_v17, %v72_v17  ;;  %1324 = vset.pattern.permute.xlu0 %v1420_v13  ;;  %1326 = vset.pattern.permute.xlu1 %v1421_v15  ;;  %v203_v17 = vsub.s32 3, %v1504_v24 }
  0x24   :  { %1215 = vmatpush3.bf16.msra.mxu0 %v1479_v9  ;;  %513 = vperm.xlu0 %1324, %v509_v7  }
  0x25   :  { %1216 = vmatprep.subr.bf16.mxu0 %v1416_v0  ;;  %524 = vperm.xlu1 %1326, %v522_v14  }
  0x28   :  { %1217 = vmatpush3.bf16.msra.mxu0 %v1483_v11  ;;  %1327 = vset.pattern.permute.xlu0 %v1421_v15 }
  0x29   :  { %1218 = vmatprep.subr.bf16.mxu0 %v1416_v0  ;;  %642 = vrot.lane.b32.xlu1 %v1458_v1, %s1418_s23 }
  0x2c   :  { %1219 = vmatpush3.bf16.msra.mxu0 %v1488_v16 }
  0x2d   :  { %1248 = vmatprep.subr.bf16.mxu0 %v1416_v0  ;;  %638 = vrot.lane.b32.xlu1 %v1465_v3, %s1418_s23 }
  0x2f   :  { %1221 = vmatmul.mubr.bf16.vlgmr.msra.gmra.mxu0 %v73_v18  ;;  %v204_v18 = vrot.slane %v1512_v26, %v203_v17 }
  0x30   :  { %1256 = vmatprep.mubr.msk.bf16.mxu0 %vm1417_vm0, %v1416_v0 }
  0x31   :  { %634 = vrot.lane.b32.xlu1 %v1475_v8, %s1418_s23 }
  0x35   :  { %630 = vrot.lane.b32.xlu1 %v1483_v11, %s1418_s23 }
  0x84   :  { %v316_v62 = vpop.permute.xlu0 %315  ;;  %v312_v4 = vpop.permute.xlu1 %311 }
  0x88   :  { %v314_v63 = vpop.permute.xlu0 %313  ;;  %v310_v6 = vpop.permute.xlu1 %309 }
  0xef   :  { %v160_v28 = vpop.f32.mrf.mxu0 }
  0xf0   :  { %v161_v29 = vadd.f32 %v160_v28, %v77_v27 }
  0xf1   :  { %v1222_v30 = vpop.f32.mrf.mxu0 }
  0xf2   :  { %v167_v31 = vsel %vm166_vm2, %v161_v29, 0.0 }
  0xf3   :  { %v168_v32 = vrot.slane %v167_v31, 4  ;;  %v163_v33 = vpop.f32.mrf.mxu0 }
  0xf5   :  { %v169_v34 = vadd.f32 %v168_v32, %v167_v31  ;;  %v1223_v35 = vpop.f32.mrf.mxu0 }
  0xf7   :  { %v170_v36 = vrot.slane %v169_v34, 2 }
  0xf9   :  { %v171_v37 = vadd.f32 %v170_v36, %v169_v34 }
  0xfb   :  { %v172_v38 = vrot.slane %v171_v37, 1 }
  0xfd   :  { %v173_v39 = vadd.f32 %v172_v38, %v171_v37 }
  0xff   :  { %v175_v40 = vmul.f32 0.125, %v173_v39 }
 0x101   :  { %v176_v41 = vsub.f32 %v161_v29, %v175_v40 }
 0x103   :  { %v177_v42 = vmul.f32 %v176_v41, %v176_v41 }
 0x105   :  { %v178_v43 = vsel %vm166_vm2, %v177_v42, 0.0 }
 0x106   :  { %v179_v44 = vrot.slane %v178_v43, 4 }
 0x108   :  { %v180_v45 = vadd.f32 %v179_v44, %v178_v43  ;;  %v295_v43 = vsub.s32 4, %v1504_v24  ;;  %v300_v44 = vsub.s32 5, %v1504_v24 }
 0x10a   :  { %v181_v46 = vrot.slane %v180_v45, 2 }
 0x10c   :  { %v182_v47 = vadd.f32 %v181_v46, %v180_v45  ;;  %v296_v45 = vrot.slane %v1512_v26, %v295_v43 }
 0x10e   :  { %v183_v48 = vrot.slane %v182_v47, 1 }
 0x110   :  { %v184_v49 = vadd.f32 %v183_v48, %v182_v47  ;;  %v301_v48 = vrot.slane %v1512_v26, %v300_v44 }
 0x112   :  { %v185_v50 = vmul.f32 0.125, %v184_v49 }
 0x114   :  { %v186_v51 = vadd.f32 1e-05, %v185_v50 }
 0x116   :  { %1366 = vrsqrt.f32 %v186_v51 }
 0x123   :  { %v1367_v55 = vpop.eup %1366 }
 0x124   :  { %v188_v56 = vmul.f32 %v1367_v55, %v176_v41  ;;  %v1564_v55 = vld [vmem:[#allocation2 + $0x98] ss:$24 sps:$4 sm:$0xff]  }
 0x125   :  { %1249 = vmatpush3.bf16.msra.mxu0 %v1564_v55 }
 0x126   :  { %v193_v58 = vmul.f32 %v192_v54, %v188_v56  ;;  %1250 = vmatprep.subr.bf16.mxu0 %v1416_v0  ;;  %v1568_v56 = vld [vmem:[#allocation2 + $0x68] ss:$24 sps:$4 sm:$0xff]  }
 0x128   :  { %v198_v59 = vadd.f32 %v197_v57, %v193_v58  ;;  %v1572_v57 = vld [vmem:[#allocation2 + $0x38] ss:$24 sps:$4 sm:$0xff]   ;;  %v1576_v58 = vld [vmem:[#allocation2 + $0x8] ss:$24 sps:$4 sm:$0xff]  }
 0x129   :  { %1251 = vmatpush3.bf16.msra.mxu0 %v1568_v56 }
 0x12a   :  { %v199_v60 = vmax.f32 %v198_v59, 0.0  ;;  %1252 = vmatprep.subr.bf16.mxu0 %v1416_v0  ;;  %v511_v59 = vand.u32 127, %v74_v23  ;;  %v530_v23 = vld [vmem:[%s1759_s3 + $0x30] sm:$0xff] }
 0x12c   :  { %v200_v61 = vpack.c.bf16 %v199_v60, %v199_v60  ;;  %v519_v60 = vpop.permute.xlu1 %518 }
 0x12d   :  { %1253 = vmatpush3.bf16.msra.mxu0 %v1572_v57  ;;  %vm520_vm3 = vcmp.eq.s32.totalorder %v511_v59, %v519_v60 }
 0x12e   :  { %1233 = vmatmul.mubr.msk.bf16.vlgmr.msra.gmra.mxu1 %vm166_vm2, %v200_v61  ;;  %1254 = vmatprep.subr.bf16.mxu0 %v1416_v0  ;;  %v514_v61 = vpop.permute.xlu0 %513 }
 0x12f   :  { %1244 = vmatprep.mubr.msk.bf16.mxu1 %vm1417_vm0, %v1416_v0  ;;  %1237 = vmatpush3.bf16.msra.mxu1 %v316_v62  ;;  %v532_v62 = vld [vmem:[%s1759_s3 + $0x50] sm:$0xff]  ;;  %vm515_vm4 = vcmp.eq.s32.totalorder %v511_v59, %v514_v61  ;;  %v405_v61 = vld [vmem:[%s1759_s3 + $0x22] ss:$0 sm:$0xff] }
 0x130   :  { %1238 = vmatprep.subr.bf16.mxu1 %v1416_v0  ;;  %vm521_vm5 = vmor %vm515_vm4, %vm520_vm3 }
 0x131   :  { %1255 = vmatpush3.bf16.msra.mxu0 %v1576_v58 }
 0x132   :  { %1289 = vmatprep.subr.bf16.mxu0 %v1416_v0 }
 0x133   :  { %1239 = vmatpush3.bf16.msra.mxu1 %v314_v63  ;;  %v531_v63 = vld [vmem:[%s1759_s3 + $0x40] sm:$0xff] }
 0x134   :  { %1240 = vmatprep.subr.bf16.mxu1 %v1416_v0 }
 0x137   :  { %1241 = vmatpush3.bf16.msra.mxu1 %v312_v4  ;;  %v33_v4 = vld [vmem:[%s1756_s0 + $0x8] sm:$0xff] }
 0x138   :  { %1242 = vmatprep.subr.bf16.mxu1 %v1416_v0  ;;  %500 = vrot.lane.b32.xlu0 %v33_v4, %s1422_s9 }
 0x13b   :  { %1243 = vmatpush3.bf16.msra.mxu1 %v310_v6  ;;  %v525_v6 = vpop.permute.xlu1 %524 }
 0x13c   :  { %1260 = vmatprep.subr.mxu1 %v1416_v0  ;;  %vm526_vm6 = vcmp.eq.s32.totalorder %v511_v59, %v525_v6  ;;  %640 = vrot.lane.b32.xlu0 %v1461_v2, %s1418_s23  ;;  %v308_v2 = vrot.slane %v1512_v26, %v307_v10 }
 0x13d   :  { %vm527_vm8 = vmor %vm521_vm5, %vm526_vm6 }
 0x13e   :  { %v1135_v7 = vsel %vm527_vm8, 1.0, %v1416_v0 }
 0x140   :  { %636 = vrot.lane.b32.xlu0 %v1471_v5, %s1418_s23 }
 0x144   :  { %632 = vrot.lane.b32.xlu0 %v1479_v9, %s1418_s23 }
 0x1ee   :  { %v266_v19 = vpop.f32.mrf.mxu1 }
 0x1ef   :  { %v267_v20 = vadd.f32 %v266_v19, %v204_v18 }
 0x1f0   :  { %v1234_v21 = vpop.f32.mrf.mxu1 }
 0x1f1   :  { %v272_v1 = vsel %vm166_vm2, %v267_v20, 0.0 }
 0x1f2   :  { %v273_v22 = vrot.slane %v272_v1, 4  ;;  %v269_v27 = vpop.f32.mrf.mxu1 }
 0x1f4   :  { %v274_v3 = vadd.f32 %v273_v22, %v272_v1  ;;  %v1235_v28 = vpop.f32.mrf.mxu1 }
 0x1f6   :  { %v275_v29 = vrot.slane %v274_v3, 2 }
 0x1f8   :  { %v276_v8 = vadd.f32 %v275_v29, %v274_v3 }
 0x1fa   :  { %v277_v30 = vrot.slane %v276_v8, 1 }
 0x1fc   :  { %v278_v31 = vadd.f32 %v277_v30, %v276_v8 }
 0x1fe   :  { %v279_v11 = vmul.f32 0.125, %v278_v31 }
 0x200   :  { %v280_v32 = vsub.f32 %v267_v20, %v279_v11 }
 0x202   :  { %v281_v33 = vmul.f32 %v280_v32, %v280_v32 }
 0x204   :  { %v282_v34 = vsel %vm166_vm2, %v281_v33, 0.0 }
 0x205   :  { %v283_v35 = vrot.slane %v282_v34, 4 }
 0x207   :  { %v284_v36 = vadd.f32 %v283_v35, %v282_v34 }
 0x209   :  { %v285_v37 = vrot.slane %v284_v36, 2 }
 0x20b   :  { %v286_v38 = vadd.f32 %v285_v37, %v284_v36  ;;  %v387_v37 = vsub.s32 7, %v1504_v24 }
 0x20d   :  { %v287_v39 = vrot.slane %v286_v38, 1 }
 0x20f   :  { %v288_v40 = vadd.f32 %v287_v39, %v286_v38  ;;  %v388_v38 = vrot.slane %v1512_v26, %v387_v37  ;;  %v501_v26 = vpop.permute.xlu0 %500 }
 0x211   :  { %v289_v41 = vmul.f32 0.125, %v288_v40 }
 0x213   :  { %v290_v42 = vadd.f32 1e-05, %v289_v41  ;;  %v1129_v41 = vld [vmem:[%s1759_s3 + $0x10] ss:$0 sm:$0xff] }
 0x215   :  { %1368 = vrsqrt.f32 %v290_v42 }
 0x222   :  { %v1369_v46 = vpop.eup %1368 }
 0x223   :  { %v292_v47 = vmul.f32 %v1369_v46, %v280_v32 }
 0x225   :  { %v297_v49 = vmul.f32 %v296_v45, %v292_v47 }
 0x227   :  { %v302_v50 = vadd.f32 %v301_v48, %v297_v49 }
 0x229   :  { %v303_v51 = vmax.f32 %v302_v50, 0.0  ;;  %v643_v50 = vpop.permute.xlu1 %642 }
 0x22b   :  { %v304_v54 = vpack.c.bf16 %v303_v51, %v303_v51  ;;  %v641_v51 = vpop.permute.xlu0 %640 }
 0x22d   :  { %1245 = vmatmul.mubr.msk.bf16.vlgmr.msra.gmra.mxu1 %vm166_vm2, %v304_v54  ;;  %v639_v54 = vpop.permute.xlu1 %638 }
 0x22e   :  { %1266 = vmatprep.mubr.msk.f32.mxu1 %vm1417_vm0, %v1416_v0  ;;  %1261 = vmatpush3.msra.mxu1 %v532_v62 }
 0x22f   :  { %1262 = vmatprep.subr.mxu1 %v1416_v0  ;;  %v637_v59 = vpop.permute.xlu0 %636 }
 0x230   :  { %1263 = vmatpush3.msra.mxu1 %v531_v63 }
 0x231   :  { %1264 = vmatprep.subr.mxu1 %v1416_v0  ;;  %v635_v60 = vpop.permute.xlu1 %634 }
 0x232   :  { %1265 = vmatpush3.msra.mxu1 %v530_v23 }
 0x233   :  { %1269 = vmatprep.subr.bf16.mxu1 %v1416_v0 }
 0x235   :  { %1267 = vmatmul.mubr.msk.f32.vlgmr.msra.gmra.mxu1 %vm533_vm7, %v1135_v7 }
 0x236   :  { %1285 = vmatprep.mubr.msk.bf16.mxu1 %vm1417_vm0, %v1416_v0  ;;  %1270 = vmatpush3.bf16.msra.mxu1 %v643_v50 }
 0x237   :  { %1271 = vmatprep.subr.bf16.mxu1 %v1416_v0 }
 0x23a   :  { %1272 = vmatpush3.bf16.msra.mxu1 %v641_v51 }
 0x23b   :  { %1273 = vmatprep.subr.bf16.mxu1 %v1416_v0 }
 0x23e   :  { %1274 = vmatpush3.bf16.msra.mxu1 %v639_v54 }
 0x23f   :  { %1275 = vmatprep.subr.bf16.mxu1 %v1416_v0 }
 0x242   :  { %1276 = vmatpush3.bf16.msra.mxu1 %v637_v59 }
 0x243   :  { %1277 = vmatprep.subr.bf16.mxu1 %v1416_v0 }
 0x246   :  { %1278 = vmatpush3.bf16.msra.mxu1 %v635_v60 }
 0x247   :  { %1279 = vmatprep.subr.bf16.mxu1 %v1416_v0 }
 0x2ed   :  { %v358_v12 = vpop.f32.mrf.mxu1 }
 0x2ee   :  { %v359_v13 = vadd.f32 %v358_v12, %v308_v2 }
 0x2ef   :  { %v1246_v14 = vpop.f32.mrf.mxu1 }
 0x2f0   :  { %v364_v18 = vsel %vm166_vm2, %v359_v13, 0.0 }
 0x2f1   :  { %v365_v19 = vrot.slane %v364_v18, 4  ;;  %v361_v20 = vpop.f32.mrf.mxu1 }
 0x2f3   :  { %v366_v21 = vadd.f32 %v365_v19, %v364_v18  ;;  %v1247_v1 = vpop.f32.mrf.mxu1 }
 0x2f5   :  { %v367_v22 = vrot.slane %v366_v21, 2  ;;  %v603_v48 = vpop.f32.mrf.mxu1 }
 0x2f6   :  { %608 = vrot.lane.b32.xlu1 %v603_v48, %s1422_s9 }
 0x2f7   :  { %v368_v5 = vadd.f32 %v367_v22, %v366_v21  ;;  %v1268_v49 = vpop.f32.mrf.mxu1 }
 0x2f9   :  { %v369_v27 = vrot.slane %v368_v5, 1 }
 0x2fa   :  { %735 = vrot.lane.b32.xlu1 %v1564_v55, %s1418_s23  ;;  %v633_v55 = vpop.permute.xlu0 %632 }
 0x2fb   :  { %v370_v3 = vadd.f32 %v369_v27, %v368_v5  ;;  %1280 = vmatpush3.bf16.msra.mxu1 %v633_v55 }
 0x2fc   :  { %1281 = vmatprep.subr.bf16.mxu1 %v1416_v0 }
 0x2fd   :  { %v371_v9 = vmul.f32 0.125, %v370_v3 }
 0x2fe   :  { %731 = vrot.lane.b32.xlu1 %v1572_v57, %s1418_s23  ;;  %v631_v57 = vpop.permute.xlu1 %630 }
 0x2ff   :  { %v372_v28 = vsub.f32 %v359_v13, %v371_v9  ;;  %1282 = vmatpush3.bf16.msra.mxu1 %v631_v57 }
 0x300   :  { %1283 = vmatprep.subr.bf16.mxu1 %v1416_v0 }
 0x301   :  { %v373_v29 = vmul.f32 %v372_v28, %v372_v28 }
 0x303   :  { %v374_v8 = vsel %vm166_vm2, %v373_v29, 0.0 }
 0x304   :  { %v375_v30 = vrot.slane %v374_v8, 4 }
 0x306   :  { %v376_v31 = vadd.f32 %v375_v30, %v374_v8 }
 0x308   :  { %v377_v11 = vrot.slane %v376_v31, 2 }
 0x30a   :  { %v378_v32 = vadd.f32 %v377_v11, %v376_v31 }
 0x30c   :  { %v379_v33 = vrot.slane %v378_v32, 1 }
 0x30e   :  { %v380_v34 = vadd.f32 %v379_v33, %v378_v32 }
 0x310   :  { %v381_v35 = vmul.f32 0.125, %v380_v34 }
 0x312   :  { %v382_v36 = vadd.f32 1e-05, %v381_v35 }
 0x314   :  { %1370 = vrsqrt.f32 %v382_v36 }
 0x321   :  { %v1371_v39 = vpop.eup %1370 }
 0x322   :  { %v384_v40 = vmul.f32 %v1371_v39, %v372_v28 }
 0x324   :  { %v389_v42 = vmul.f32 %v388_v38, %v384_v40 }
 0x326   :  { %v394_v45 = vadd.f32 %v1129_v41, %v389_v42 }
 0x328   :  { %v395_v46 = vmax.f32 %v394_v45, 0.0 }
 0x32a   :  { %v396_v47 = vpack.c.bf16 %v395_v46, %v395_v46 }
 0x32c   :  { %1257 = vmatmul.mubr.msk.bf16.vlgmr.msra.gmra.mxu0 %vm166_vm2, %v396_v47 }
 0x32d   :  { %1297 = vmatprep.mubr.msk.bf16.mxu0 %vm1417_vm0, %v1416_v0 }
 0x368   :  { %v609_v35 = vpop.permute.xlu1 %608 }
 0x3ec   :  { %v467_v62 = vpop.f32.mrf.mxu0 }
 0x3ed   :  { %v1637_v63 = vadd.f32 %v467_v62, %v405_v61 }
 0x3ee   :  { %v1258_v4 = vpop.f32.mrf.mxu0 }
 0x3ef   :  { %v476_v23 = vand.u32 2147483647, %v1637_v63  ;;  %v473_v5 = vmax.f32 %v1637_v63, 0.0  ;;  %vm474_vm10 = vcmp.ne.f32.partialorder %v1637_v63, %v1637_v63 }
 0x3f0   :  { %v470_v6 = vpop.f32.mrf.mxu0 }
 0x3f1   :  { %v477_v7 = vsub.f32 0.0, %v476_v23 }
 0x3f2   :  { %v1259_v2 = vpop.f32.mrf.mxu0 }
 0x3f3   :  { %v478_v12 = vmul.f32 1.442695, %v477_v7 }
 0x3f5   :  { %1372 = vpow2.f32 %v478_v12 }
 0x402   :  { %v1373_v13 = vpop.eup %1372 }
 0x403   :  { %v480_v14 = vadd.f32 1.0, %v1373_v13  ;;  %v483_v18 = vmul.f32 -0.5, %v1373_v13  ;;  %v486_v20 = vand.u32 2147483647, %v1373_v13 }
 0x405   :  { %1374 = vlog2.f32 %v480_v14  ;;  %v484_v19 = vadd.f32 1.0, %v483_v18  ;;  %vm487_vm9 = vcmp.lt.f32.partialorder %v486_v20, 0.0004427343 }
 0x407   :  { %v485_v22 = vmul.f32 %v1373_v13, %v484_v19 }
 0x412   :  { %v1375_v21 = vpop.eup %1374 }
 0x413   :  { %v482_v1 = vmul.f32 0.6931472, %v1375_v21 }
 0x415   :  { %v488_v27 = vsel %vm487_vm9, %v485_v22, %v482_v1 }
 0x416   :  { %v489_v3 = vadd.f32 %v488_v27, %v473_v5 }
 0x418   :  { %v490_v9 = vsel %vm474_vm10, %v1637_v63, %v489_v3  ;;  %v1344_v3 = vld [vmem:[#allocation2 + $0x9c] ss:$24 sps:$4 sm:$0xff]  }
 0x419   :  { %v491_v28 = vadd.f32 0.0001, %v490_v9  ;;  %v1346_v9 = vld [vmem:[#allocation2 + $0x3c] ss:$24 sps:$4 sm:$0xff]  }
 0x41b   :  { %1376 = vrsqrt.f32 %v491_v28  ;;  %vm494_vm11 = vcmp.eq.f32.partialorder %v491_v28, inf  ;;  %v497_v30 = vand.u32 2147483648, %v491_v28  ;;  %vm496_vm12 = vcmp.eq.f32.partialorder %v491_v28, 0.0 }
 0x428   :  { %v1377_v29 = vpop.eup %1376 }
 0x429   :  { %v493_v8 = vmul.f32 %v1377_v29, %v491_v28  ;;  %v1350_v29 = vld [vmem:[#allocation2 + $0xa4] ss:$24 sps:$4 sm:$0xff]  }
 0x42b   :  { %v495_v31 = vsel %vm494_vm11, %v491_v28, %v493_v8  ;;  %v1348_v28 = vld [vmem:[#allocation2 + $0xa0] ss:$24 sps:$4 sm:$0xff]   ;;  %v1351_v8 = vld [vmem:[#allocation2 + $0x9c] ss:$24 sps:$4 sm:$0xff]  }
 0x42c   :  { %v1644_v11 = vsel %vm496_vm12, %v497_v30, %v495_v31  ;;  %1022 = vrot.lane.b32.xlu1 %v1348_v28, %s1418_s23  ;;  %v1352_v30 = vld [vmem:[#allocation2 + $0x70] ss:$24 sps:$4 sm:$0xff]   ;;  %v1354_v31 = vld [vmem:[#allocation2 + $0x74] ss:$24 sps:$4 sm:$0xff]  }
 0x42d   :  { %v503_v32 = vmul.f32 %v501_v26, %v1644_v11 }
 0x42f   :  { %505 = vrot.lane.b32.xlu0 %v503_v32, %s1423_s14  ;;  %v1355_v32 = vld [vmem:[#allocation2 + $0x6c] ss:$24 sps:$4 sm:$0xff]  }
 0x430   :  { %1020 = vrot.lane.b32.xlu1 %v1351_v8, %s1418_s23 }
 0x433   :  { %628 = vrot.lane.b32.xlu0 %v1488_v16, %s1418_s23 }
 0x434   :  { %1018 = vrot.lane.b32.xlu1 %v1354_v31, %s1418_s23 }
 0x437   :  { %733 = vrot.lane.b32.xlu0 %v1568_v56, %s1418_s23  ;;  %v736_v56 = vpop.permute.xlu1 %735 }
 0x438   :  { %1290 = vmatpush3.bf16.msra.mxu0 %v736_v56 }
 0x439   :  { %1291 = vmatprep.subr.bf16.mxu0 %v1416_v0 }
 0x43b   :  { %729 = vrot.lane.b32.xlu0 %v1576_v58, %s1418_s23  ;;  %v732_v39 = vpop.permute.xlu1 %731 }
 0x43f   :  { %1024 = vrot.lane.b32.xlu0 %v1350_v29, %s1418_s23 }
 0x443   :  { %1016 = vrot.lane.b32.xlu0 %v1352_v30, %s1418_s23 }
 0x447   :  { %1014 = vrot.lane.b32.xlu0 %v1355_v32, %s1418_s23 }
 0x4a1   :  { %v506_v33 = vpop.permute.xlu0 %505 }
 0x4a2   :  { %v1654_v34 = vadd.f32 %v506_v33, %v1637_v63  ;;  %v1358_v33 = vld [vmem:[#allocation2 + $0x44] ss:$24 sps:$4 sm:$0xff]  }
 0x4a3   :  { %1012 = vrot.lane.b32.xlu0 %v1358_v33, %s1418_s23 }
 0x4a4   :  { %v612_v36 = vsel %vm611_vm13, %v1654_v34, %v609_v35  ;;  %v1359_v35 = vld [vmem:[#allocation2 + $0x3c] ss:$24 sps:$4 sm:$0xff]  }
 0x4a5   :  { %1106 = vst [vmem:[%s1760_s4 + $0x8] sm:$0xff] %v612_v36  ;;  %v629_v16 = vpop.permute.xlu0 %628  ;;  %v623_v38 = vpack.c.bf16 %v612_v36, %v612_v36  ;;  %v1360_v36 = vld [vmem:[#allocation2 + $0x10] ss:$24 sps:$4 sm:$0xff]  }
 0x4a6   :  { %1284 = vmatpush3.bf16.msra.mxu1 %v629_v16  ;;  %v1362_v16 = vld [vmem:[#allocation2 + $0x14] ss:$24 sps:$4 sm:$0xff]  }
 0x4a7   :  { %1004 = vrot.lane.b32.xlu0 %v1360_v36, %s1418_s23 }
 0x4a9   :  { %1286 = vmatmul.mubr.bf16.vlgmr.msra.gmra.mxu1 %v623_v38  ;;  %v734_v58 = vpop.permute.xlu0 %733  ;;  %v1363_v38 = vld [vmem:[#allocation2 + $0xc] ss:$24 sps:$4 sm:$0xff]  }
 0x4aa   :  { %1078 = vmatprep.mubr.bf16.mxu1 %v1421_v15  ;;  %1292 = vmatpush3.bf16.msra.mxu0 %v734_v58  ;;  %v1669_v15 = vld [vmem:[%s1759_s3 + $0x10] sm:$0xfe] }
 0x4ab   :  { %1293 = vmatprep.subr.bf16.mxu0 %v1416_v0  ;;  %v627_v41 = vrot.slane %v1669_v15, %v1519_v52  ;;  %v716_v18 = vrot.slane %v1669_v15, %v196_v53  ;;  %v721_v20 = vrot.slane %v1669_v15, %v203_v17  ;;  %v1345_v53 = vld [vmem:[#allocation2 + $0x6c] ss:$24 sps:$4 sm:$0xff]   ;;  %1002 = vrot.lane.b32.xlu0 %v1363_v38, %s1418_s23 }
 0x4ac   :  { %v1347_v17 = vld [vmem:[#allocation2 + $0xc] ss:$24 sps:$4 sm:$0xff]   ;;  %v728_v56 = vrot.slane %v1669_v15, %v295_v43  ;;  %v820_v36 = vrot.slane %v1669_v15, %v387_v37 }
 0x4ad   :  { %v730_v40 = vpop.permute.xlu0 %729 }
 0x4ae   :  { %1294 = vmatpush3.bf16.msra.mxu0 %v732_v39 }
 0x4af   :  { %1295 = vmatprep.subr.bf16.mxu0 %v1416_v0 }
 0x4b2   :  { %1296 = vmatpush3.bf16.msra.mxu0 %v730_v40 }
 0x4b3   :  { %1301 = vmatprep.subr.bf16.mxu0 %v1416_v0 }
 0x569   :  { %v686_v42 = vpop.f32.mrf.mxu1 }
 0x56a   :  { %v687_v45 = vadd.f32 %v686_v42, %v627_v41 }
 0x56b   :  { %v1287_v46 = vpop.f32.mrf.mxu1 }
 0x56c   :  { %v692_v47 = vsel %vm166_vm2, %v687_v45, 0.0 }
 0x56d   :  { %v693_v48 = vrot.slane %v692_v47, 4  ;;  %v689_v49 = vpop.f32.mrf.mxu1 }
 0x56f   :  { %v694_v26 = vadd.f32 %v693_v48, %v692_v47  ;;  %v1288_v50 = vpop.f32.mrf.mxu1 }
 0x571   :  { %v695_v51 = vrot.slane %v694_v26, 2 }
 0x573   :  { %v696_v54 = vadd.f32 %v695_v51, %v694_v26 }
 0x575   :  { %v697_v59 = vrot.slane %v696_v54, 1 }
 0x577   :  { %v698_v60 = vadd.f32 %v697_v59, %v696_v54 }
 0x579   :  { %v699_v55 = vmul.f32 0.125, %v698_v60 }
 0x57b   :  { %v700_v57 = vsub.f32 %v687_v45, %v699_v55 }
 0x57d   :  { %v701_v61 = vmul.f32 %v700_v57, %v700_v57 }
 0x57f   :  { %v702_v62 = vsel %vm166_vm2, %v701_v61, 0.0 }
 0x580   :  { %v703_v4 = vrot.slane %v702_v62, 4 }
 0x582   :  { %v704_v23 = vadd.f32 %v703_v4, %v702_v62 }
 0x584   :  { %v705_v6 = vrot.slane %v704_v23, 2 }
 0x586   :  { %v706_v7 = vadd.f32 %v705_v6, %v704_v23 }
 0x588   :  { %v707_v2 = vrot.slane %v706_v7, 1 }
 0x58a   :  { %v708_v12 = vadd.f32 %v707_v2, %v706_v7  ;;  %v808_v7 = vrot.slane %v1669_v15, %v300_v44 }
 0x58c   :  { %v709_v13 = vmul.f32 0.125, %v708_v12  ;;  %v813_v12 = vrot.slane %v1669_v15, %v307_v10 }
 0x58e   :  { %v710_v14 = vadd.f32 1e-05, %v709_v13 }
 0x590   :  { %1378 = vrsqrt.f32 %v710_v14 }
 0x59d   :  { %v1379_v19 = vpop.eup %1378 }
 0x59e   :  { %v712_v21 = vmul.f32 %v1379_v19, %v700_v57 }
 0x5a0   :  { %v717_v1 = vmul.f32 %v716_v18, %v712_v21  ;;  %v1023_v21 = vpop.permute.xlu1 %1022 }
 0x5a2   :  { %v722_v22 = vadd.f32 %v721_v20, %v717_v1  ;;  %v1025_v1 = vpop.permute.xlu0 %1024 }
 0x5a4   :  { %v723_v5 = vmax.f32 %v722_v22, 0.0  ;;  %v1021_v22 = vpop.permute.xlu1 %1020 }
 0x5a6   :  { %v724_v27 = vpack.c.bf16 %v723_v5, %v723_v5  ;;  %v1034_v5 = vsel %vm166_vm2, %v1023_v21, %v1025_v1  ;;  %v1017_v44 = vpop.permute.xlu0 %1016 }
 0x5a7   :  { %1054 = vmatprep.subr.bf16.mxu1 %v1034_v5 }
 0x5a8   :  { %1298 = vmatmul.mubr.msk.bf16.vlgmr.msra.gmra.mxu0 %vm166_vm2, %v724_v27  ;;  %v1033_v27 = vsel %vm166_vm2, %v1021_v22, %v1023_v21 }
 0x5a9   :  { %1309 = vmatprep.mubr.msk.bf16.mxu0 %vm1417_vm0, %v1416_v0  ;;  %1302 = vmatpush3.bf16.msra.mxu0 %v1344_v3  ;;  %v1019_v3 = vpop.permute.xlu1 %1018 }
 0x5aa   :  { %1303 = vmatprep.subr.bf16.mxu0 %v1416_v0  ;;  %1055 = vmatpush1.bf16.msra.mxu1 %v1033_v27  ;;  %v1032_v10 = vsel %vm166_vm2, %v1017_v44, %v1019_v3 }
 0x5ab   :  { %1056 = vmatprep.subr.bf16.mxu1 %v1032_v10 }
 0x5ad   :  { %1304 = vmatpush3.bf16.msra.mxu0 %v1345_v53  ;;  %v1015_v53 = vpop.permute.xlu0 %1014 }
 0x5ae   :  { %1305 = vmatprep.subr.bf16.mxu0 %v1416_v0 }
 0x5b1   :  { %1306 = vmatpush3.bf16.msra.mxu0 %v1346_v9  ;;  %v1031_v9 = vsel %vm166_vm2, %v1015_v53, %v1017_v44  ;;  %v1013_v28 = vpop.permute.xlu0 %1012 }
 0x5b2   :  { %1307 = vmatprep.subr.bf16.mxu0 %v1416_v0  ;;  %v1356_v0 = vld [vmem:[#allocation2 + $0x40] ss:$24 sps:$4 sm:$0xff]   ;;  %1057 = vmatpush1.bf16.msra.mxu1 %v1031_v9 }
 0x5b3   :  { %1010 = vrot.lane.b32.xlu1 %v1356_v0, %s1418_s23 }
 0x5b5   :  { %1308 = vmatpush3.bf16.msra.mxu0 %v1347_v17  ;;  %v1005_v31 = vpop.permute.xlu0 %1004 }
 0x5b7   :  { %1008 = vrot.lane.b32.xlu1 %v1359_v35, %s1418_s23 }
 0x5b9   :  { %v1003_v0 = vpop.permute.xlu0 %1002 }
 0x5ba   :  { %v1027_v35 = vsel %vm166_vm2, %v1003_v0, %v1005_v31 }
 0x5bb   :  { %1006 = vrot.lane.b32.xlu1 %v1362_v16, %s1418_s23 }
 0x625   :  { %v1011_v17 = vpop.permute.xlu1 %1010 }
 0x626   :  { %v1030_v8 = vsel %vm166_vm2, %v1011_v17, %v1013_v28 }
 0x627   :  { %1058 = vmatprep.subr.bf16.mxu1 %v1030_v8  ;;  %v1101_v8 = vsel %vm611_vm13, %v1637_v63, %v1644_v11 }
 0x629   :  { %v1009_v29 = vpop.permute.xlu1 %1008 }
 0x62a   :  { %v1029_v30 = vsel %vm166_vm2, %v1009_v29, %v1011_v17 }
 0x62b   :  { %1059 = vmatpush1.bf16.msra.mxu1 %v1029_v30 }
 0x62d   :  { %v1007_v32 = vpop.permute.xlu1 %1006 }
 0x62e   :  { %v1028_v33 = vsel %vm166_vm2, %v1005_v31, %v1007_v32 }
 0x62f   :  { %1060 = vmatprep.subr.bf16.mxu1 %v1028_v33 }
 0x630   :  { %1061 = vmatpush1.bf16.msra.mxu1 %v1027_v35 }
 0x668   :  { %v778_v58 = vpop.f32.mrf.mxu0 }
 0x669   :  { %v779_v39 = vadd.f32 %v778_v58, %v728_v56 }
 0x66a   :  { %v1299_v40 = vpop.f32.mrf.mxu0 }
 0x66b   :  { %v784_v41 = vsel %vm166_vm2, %v779_v39, 0.0 }
 0x66c   :  { %v785_v42 = vrot.slane %v784_v41, 4  ;;  %v781_v45 = vpop.f32.mrf.mxu0 }
 0x66e   :  { %v786_v46 = vadd.f32 %v785_v42, %v784_v41  ;;  %v1300_v47 = vpop.f32.mrf.mxu0 }
 0x670   :  { %v787_v48 = vrot.slane %v786_v46, 2 }
 0x672   :  { %v788_v49 = vadd.f32 %v787_v48, %v786_v46 }
 0x674   :  { %v789_v26 = vrot.slane %v788_v49, 1 }
 0x676   :  { %v790_v50 = vadd.f32 %v789_v26, %v788_v49 }
 0x678   :  { %v791_v51 = vmul.f32 0.125, %v790_v50 }
 0x67a   :  { %v792_v54 = vsub.f32 %v779_v39, %v791_v51 }
 0x67c   :  { %v793_v59 = vmul.f32 %v792_v54, %v792_v54 }
 0x67e   :  { %v794_v60 = vsel %vm166_vm2, %v793_v59, 0.0 }
 0x67f   :  { %v795_v55 = vrot.slane %v794_v60, 4 }
 0x681   :  { %v796_v43 = vadd.f32 %v795_v55, %v794_v60 }
 0x683   :  { %v797_v57 = vrot.slane %v796_v43, 2 }
 0x685   :  { %v798_v61 = vadd.f32 %v797_v57, %v796_v43  ;;  %v614_v57 = vld [vmem:[%s1759_s3 + $0x20] sm:$0x3] }
 0x687   :  { %v799_v62 = vrot.slane %v798_v61, 1 }
 0x689   :  { %v800_v4 = vadd.f32 %v799_v62, %v798_v61  ;;  %v912_v61 = vrot.slane %v614_v57, %v1507_v25 }
 0x68b   :  { %v801_v23 = vmul.f32 0.125, %v800_v4 }
 0x68d   :  { %v802_v6 = vadd.f32 1e-05, %v801_v23  ;;  %v917_v23 = vrot.slane %v614_v57, %v1519_v52 }
 0x68f   :  { %1380 = vrsqrt.f32 %v802_v6 }
 0x69c   :  { %v1381_v2 = vpop.eup %1380 }
 0x69d   :  { %v804_v13 = vmul.f32 %v1381_v2, %v792_v54 }
 0x69f   :  { %v809_v14 = vmul.f32 %v808_v7, %v804_v13  ;;  %v1143_v13 = vld [vmem:[%s1759_s3 + $0x23] ss:$8 sm:$0x3] }
 0x6a1   :  { %v814_v18 = vadd.f32 %v813_v12, %v809_v14  ;;  %v943_v14 = vrot.slane %v1143_v13, %v1507_v25 }
 0x6a3   :  { %v815_v19 = vmax.f32 %v814_v18, 0.0  ;;  %v947_v18 = vrot.slane %v1143_v13, %v1519_v52  ;;  %v1390_v52 = vld [vmem:[%s1756_s0] sm:$0xff] }
 0x6a5   :  { %v816_v20 = vpack.c.bf16 %v815_v19, %v815_v19 }
 0x6a7   :  { %1310 = vmatmul.mubr.msk.bf16.vlgmr.msra.gmra.mxu0 %vm166_vm2, %v816_v20 }
 0x767   :  { %v882_v16 = vpop.f32.mrf.mxu0 }
 0x768   :  { %v883_v38 = vadd.f32 %v882_v16, %v820_v36 }
 0x769   :  { %v1311_v56 = vpop.f32.mrf.mxu0 }
 0x76a   :  { %v888_v58 = vsel %vm166_vm2, %v883_v38, 0.0 }
 0x76b   :  { %v889_v39 = vrot.slane %v888_v58, 4  ;;  %v885_v40 = vpop.f32.mrf.mxu0 }
 0x76d   :  { %v890_v41 = vadd.f32 %v889_v39, %v888_v58  ;;  %v1312_v42 = vpop.f32.mrf.mxu0 }
 0x76f   :  { %v891_v45 = vrot.slane %v890_v41, 2 }
 0x771   :  { %v892_v46 = vadd.f32 %v891_v45, %v890_v41 }
 0x773   :  { %v893_v47 = vrot.slane %v892_v46, 1 }
 0x775   :  { %v894_v48 = vadd.f32 %v893_v47, %v892_v46 }
 0x777   :  { %v895_v49 = vmul.f32 0.125, %v894_v48 }
 0x779   :  { %v896_v26 = vsub.f32 %v883_v38, %v895_v49 }
 0x77b   :  { %v897_v50 = vmul.f32 %v896_v26, %v896_v26 }
 0x77d   :  { %v898_v24 = vsel %vm166_vm2, %v897_v50, 0.0 }
 0x77e   :  { %v899_v51 = vrot.slane %v898_v24, 4 }
 0x780   :  { %v900_v37 = vadd.f32 %v899_v51, %v898_v24 }
 0x782   :  { %v901_v15 = vrot.slane %v900_v37, 2 }
 0x784   :  { %v902_v54 = vadd.f32 %v901_v15, %v900_v37 }
 0x786   :  { %v903_v59 = vrot.slane %v902_v54, 1 }
 0x788   :  { %v904_v60 = vadd.f32 %v903_v59, %v902_v54 }
 0x78a   :  { %v905_v55 = vmul.f32 0.125, %v904_v60 }
 0x78c   :  { %v906_v43 = vadd.f32 1e-05, %v905_v55 }
 0x78e   :  { %1382 = vrsqrt.f32 %v906_v43 }
 0x79b   :  { %v1383_v62 = vpop.eup %1382 }
 0x79c   :  { %v908_v4 = vmul.f32 %v1383_v62, %v896_v26 }
 0x79e   :  { %v913_v6 = vmul.f32 %v912_v61, %v908_v4 }
 0x7a0   :  { %v918_v7 = vadd.f32 %v917_v23, %v913_v6 }
 0x7a2   :  { %v919_v2 = vmax.f32 %v918_v7, 0.0 }
 0x7a4   :  { %v920_v12 = vpack.c.bf16 %v919_v2, %v919_v2 }
 0x7a6   :  { %1156 = vmatmul.mubr.msk.bf16.vlgmr.msra.gmra.mxu1 %vm166_vm2, %v920_v12 }
 0x866   :  { %v1080_v19 = vpop.f32.mrf.mxu1 }
 0x867   :  { %v1081_v20 = vadd.f32 %v1080_v19, %v943_v14 }
 0x868   :  { %v1082_v21 = vpop.f32.mrf.mxu1 }
 0x869   :  { %v1083_v1 = vadd.f32 %v1082_v21, %v947_v18  ;;  %1087 = vmax.xlane.f32.xlu1 %v1081_v20 }
 0x86a   :  { %v1084_v22 = vpop.f32.mrf.mxu1 }
 0x86b   :  { %1109 = vst [vmem:[%s1760_s4 + $0x20] sm:$0xff] %v1083_v1 }
 0x86c   :  { %v1085_v5 = vpop.f32.mrf.mxu1 }
 0x87a   :  { %1098 = vrot.lane.b32.xlu1 %v1654_v34, %s1418_s23 }
 0x8f2   :  { %v1088_v27 = vpop.xlane.xlu1 %1087 }
 0x8f3   :  { %v1089_v44 = vsub.f32 %v1081_v20, %v1088_v27 }
 0x8f5   :  { %v1090_v3 = vmul.f32 1.442695, %v1089_v44 }
 0x8f6   :  { %v1099_v28 = vpop.permute.xlu1 %1098 }
 0x8f7   :  { %1384 = vpow2.f32 %v1090_v3  ;;  %v1102_v31 = vsel %vm166_vm2, %v1101_v8, %v1099_v28 }
 0x904   :  { %v1385_v25 = vpop.eup %1384 }
 0x905   :  { %1092 = vadd.xlane.f32.xlu0 %v1385_v25 }
 0x909   :  { %34 = vadd.xlane.f32.xlu0 %v1390_v52 }
 0x98e   :  { %v1093_v53 = vpop.xlane.xlu0 %1092 }
 0x98f   :  { %1386 = vrcp.f32 %v1093_v53 }
 0x992   :  { %v35_v10 = vpop.xlane.xlu0 %34 }
 0x993   :  { %1388 = vlog2.f32 %v35_v10 }
 0x99c   :  { %v1387_v9 = vpop.eup %1386 }
 0x99d   :  { %v1095_v17 = vmul.f32 %v1387_v9, %v1385_v25 }
 0x99f   :  { %1107 = vst [vmem:[%s1760_s4 + $0x10] sm:$0xff] %v1095_v17  ;;  %v1096_v34 = vmul.f32 %v1095_v17, %v35_v10 }
 0x9a0   :  { %v1389_v29 = vpop.eup %1388 }
 0x9a1   :  { %v37_v30 = vmul.f32 0.6931472, %v1389_v29  ;;  %1108 = vst [vmem:[%s1760_s4 + $0x18] sm:$0xff] %v1096_v34 }
 0x9a3   :  { %v1104_v32 = vsel %vm1103_vm14, %v1102_v31, %v37_v30 }
 0x9a4   :  { %1105 = vst [vmem:[%s1760_s4] sm:$0xff] %v1104_v32 }
 0x9a5   :  { %1114 = vsyncpa [#allocation3], 1 }

</bundles_post_ra>
